<compile_context>
chip_gen: v7x
topology: tpu7x:2x2x1
jax: 0.10.0
libtpu: 0.0.40
codegen_flags: <defaults>
</compile_context>

<pallas_src>
import functools

import jax
import jax.numpy as jnp
from jax import lax
from jax.experimental import pallas as pl
from jax.experimental.pallas import tpu as pltpu

GROUPS = 32
EPS = 1e-5


# --------------------------------------------------------------------------------------
# Pass 1: GroupNorm statistics -> per-image, per-channel [scale, shift]
# --------------------------------------------------------------------------------------
def _gn_stats_kernel(x_ref, gamma_ref, beta_ref, mgc_ref, mcg_ref, ss_ref, sums_ref,
                     *, count):
    # x_ref: (1, C, L) row tile; ss_ref: (1, C, 2) output; sums_ref: (C, 2) VMEM scratch.
    r = pl.program_id(1)

    @pl.when(r == 0)
    def _():
        sums_ref[...] = jnp.zeros_like(sums_ref)

    x = x_ref[0].astype(jnp.float32)                        # (C, L)
    s1 = jnp.sum(x, axis=1, keepdims=True)                  # (C, 1)
    s2 = jnp.sum(x * x, axis=1, keepdims=True)              # (C, 1)
    sums_ref[...] += jnp.concatenate([s1, s2], axis=1)      # (C, 2)

    @pl.when(r == pl.num_programs(1) - 1)
    def _():
        # Single (G, C) @ (C, 2) matmul for the group reduction (per review).
        g = jnp.dot(mgc_ref[...], sums_ref[...],
                    preferred_element_type=jnp.float32) / count          # (G, 2)
        g_mean = g[:, 0:1]
        # Single-pass E[x^2]-E[x]^2 in f32; clamp at 0 against cancellation.
        g_var = jnp.maximum(g[:, 1:2] - g_mean * g_mean, 0.0)
        c = jnp.dot(mcg_ref[...], jnp.concatenate([g_mean, g_var], axis=1),
                    preferred_element_type=jnp.float32)                  # (C, 2)
        inv = lax.rsqrt(c[:, 1:2] + EPS)
        scale = inv * gamma_ref[...]                                     # (C, 1)
        shift = beta_ref[...] - c[:, 0:1] * scale                        # (C, 1)
        ss_ref[0] = jnp.concatenate([scale, shift], axis=1)              # (C, 2)


# --------------------------------------------------------------------------------------
# Pass 2: normalize + SiLU + 3x3 conv on a row tile (1-row halo from tiny side arrays)
# --------------------------------------------------------------------------------------
def _conv_tile_kernel(x_ref, xt_ref, xb_ref, ss_ref, w_ref, b_ref, o_ref,
                      *, W, TH, cout):
    # x_ref : (1, C, TH*W)   current row tile (rows flattened onto the lane axis)
    # xt_ref: (1, 1, C, W)   row above the tile (garbage at the image top -> masked)
    # xb_ref: (1, 1, C, W)   row below the tile (garbage at the image bottom -> masked)
    # ss_ref: (1, C, 2)      per-image [scale, shift] from the stats pass
    # w_ref : (9*cout_p, C)  bf16 conv weights, tap-major, cout zero-padded to cout_p
    # b_ref : (cout_p, 1)    bias (zero-padded)
    # o_ref : (1, cout, TH*W)
    r = pl.program_id(1)
    L = TH * W
    cout_p = w_ref.shape[0] // 9

    scale = ss_ref[0, :, 0:1]                      # (C, 1) f32
    shift = ss_ref[0, :, 1:2]

    def norm_silu(xv):
        # GroupNorm affine + SiLU with the bf16 cast fused into the normalize
        # (bf16 sigmoid uses the bf16 EUP path on v6e/v7x; only one h copy is live).
        h = (xv.astype(jnp.float32) * scale + shift).astype(jnp.bfloat16)
        return h * jax.nn.sigmoid(h)

    h_mid = norm_silu(x_ref[0])                    # (C, L)  bf16
    h_top = norm_silu(xt_ref[0, 0])                # (C, W)
    h_bot = norm_silu(xb_ref[0, 0])                # (C, W)

    w_all = w_ref[...]
    taps_mid = jnp.dot(w_all, h_mid, preferred_element_type=jnp.float32)   # (9*cout_p, L)
    taps_top = jnp.dot(w_all, h_top, preferred_element_type=jnp.float32)   # (9*cout_p, W)
    taps_bot = jnp.dot(w_all, h_bot, preferred_element_type=jnp.float32)   # (9*cout_p, W)

    # Boundary / row masks hoisted out of the tap loop (per review).
    lane = lax.broadcasted_iota(jnp.int32, (1, L), 1)
    col = lane % W
    first_row = lane < W
    last_row = lane >= L - W
    col_ok = {-1: col >= 1, 1: col <= W - 2}
    at_img_top = r == 0
    at_img_bot = r == pl.num_programs(1) - 1

    acc = jnp.zeros((cout_p, L), jnp.float32)
    for ky in range(3):
        dy = ky - 1
        for kx in range(3):
            dx = kx - 1
            t = ky * 3 + kx
            off = dy * W + dx
            sl = slice(t * cout_p, (t + 1) * cout_p)     # 8-sublane-aligned slice
            tap = taps_mid[sl, :]                        # (cout_p, L)
            if off != 0:
                # XLU lane rotation (co-issues with the busy VPU/EUP slots).  The
                # wrapped lanes are exactly the ones replaced/zeroed below.
                tap = pltpu.roll(tap, (-off) % L, axis=1)
            if dy != 0:
                edge = taps_top[sl, :] if dy < 0 else taps_bot[sl, :]    # (cout_p, W)
                if dx != 0:
                    edge = pltpu.roll(edge, (-dx) % W, axis=1)
                edge_full = jnp.concatenate([edge] * TH, axis=1)         # (cout_p, L)
                row_sel = first_row if dy < 0 else last_row
                at_edge = at_img_top if dy < 0 else at_img_bot
                tap = jnp.where(row_sel, edge_full, tap)                 # halo row
                tap = jnp.where(row_sel & at_edge, 0.0, tap)             # image zero-pad
            if dx != 0:
                tap = jnp.where(col_ok[dx], tap, 0.0)                    # left/right pad
            acc = acc + tap

    acc = acc + b_ref[...].astype(jnp.float32)
    o_ref[0] = acc[:cout, :].astype(o_ref.dtype)       # lane-dense store


# --------------------------------------------------------------------------------------
# Wrapper
# --------------------------------------------------------------------------------------
def _pick_row_tile(H, W, target_lanes=512):
    # Smallest row tile dividing H whose flattened lane extent is 128-aligned and at
    # least `target_lanes` (measured tiling data: >=512 lanes reaches ~85% HBM roofline).
    for th in range(1, H):
        if H % th == 0 and (th * W) % 128 == 0 and th * W >= target_lanes:
            return th
    return H  # whole-image fallback (block == full extent is always legal)


def _vmem_limit(est_bytes):
    # Shape-derived scoped-VMEM limit (v5e default 16 MiB is too small), capped at
    # 64 MiB so it never exceeds v7x's physical VMEM.
    return int(max(32 << 20, min(64 << 20, 2 * est_bytes)))


def unet_output_layer(x_nchw, gamma, beta, w_oihw, bias, *, row_tile=None):
    """GroupNorm(32) -> SiLU -> Conv2d(3x3, stride 1, pad 1).  x_nchw: (N, Cin, H, W)."""
    N, C, H, W = x_nchw.shape
    cout = w_oihw.shape[0]
    HW = H * W
    assert C % GROUPS == 0, "GroupNorm(32) requires Cin % 32 == 0"

    TH = _pick_row_tile(H, W) if row_tile is None else int(row_tile)
    if H % TH != 0 or (TH != H and (TH * W) % 128 != 0):
        TH = H
    n_tiles = H // TH
    L = TH * W
    cg = C // GROUPS
    cout_p = ((cout + 7) // 8) * 8          # pad cout so per-tap slices are 8-aligned

    # ---- wrapper-side packing (tiny, no big transposes of x) ------------------------
    x_flat = x_nchw.reshape(N, C, HW)       # free contiguous reshape, lane-dense H*W
    # 1-row conv halos as small side arrays (~x/TH bytes each): last/first row per tile.
    x5 = x_nchw.reshape(N, C, n_tiles, TH, W)
    tile_last = jnp.transpose(x5[:, :, :, TH - 1, :], (0, 2, 1, 3))   # (N, n_tiles, C, W)
    tile_first = jnp.transpose(x5[:, :, :, 0, :], (0, 2, 1, 3))       # (N, n_tiles, C, W)

    gamma2 = gamma.reshape(C, 1).astype(jnp.float32)
    beta2 = beta.reshape(C, 1).astype(jnp.float32)
    ch = jnp.arange(C)
    m_cg = (ch[:, None] // cg == jnp.arange(GROUPS)[None, :]).astype(jnp.float32)  # (C,G)
    m_gc = m_cg.T                                                                  # (G,C)

    w_t = jnp.transpose(w_oihw, (2, 3, 0, 1))                          # (3, 3, cout, C)
    w_t = jnp.pad(w_t, ((0, 0), (0, 0), (0, cout_p - cout), (0, 0)))
    w_packed = w_t.reshape(9 * cout_p, C).astype(jnp.bfloat16)
    bias2 = jnp.pad(bias.reshape(cout, 1),
                    ((0, cout_p - cout), (0, 0))).astype(jnp.float32)

    # ---- pass 1: GroupNorm stats -> (N, C, 2) [scale, shift] -------------------------
    stats_est = 3 * C * L * 4 + 2 * GROUPS * C * 4 + 8 * C * 4
    ss = pl.pallas_call(
        functools.partial(_gn_stats_kernel, count=float(cg * HW)),
        out_shape=jax.ShapeDtypeStruct((N, C, 2), jnp.float32),
        grid_spec=pltpu.PrefetchScalarGridSpec(
            num_scalar_prefetch=0,
            grid=(N, n_tiles),
            in_specs=[
                pl.BlockSpec((1, C, L), lambda n, r: (n, 0, r)),
                pl.BlockSpec((C, 1), lambda n, r: (0, 0)),
                pl.BlockSpec((C, 1), lambda n, r: (0, 0)),
                pl.BlockSpec((GROUPS, C), lambda n, r: (0, 0)),
                pl.BlockSpec((C, GROUPS), lambda n, r: (0, 0)),
            ],
            out_specs=pl.BlockSpec((1, C, 2), lambda n, r: (n, 0, 0)),
            scratch_shapes=[pltpu.VMEM((C, 2), jnp.float32)],
        ),
        compiler_params=pltpu.CompilerParams(
            dimension_semantics=("parallel", "arbitrary"),
            vmem_limit_bytes=_vmem_limit(stats_est),
        ),
    )(x_flat, gamma2, beta2, m_gc, m_cg)

    # ---- pass 2: normalize + SiLU + 3x3 conv, row-tiled ------------------------------
    main_est = (2 * C * L * 4 + 4 * C * W * 4 + 2 * cout * L * 4     # pipelined blocks
                + C * 2 * 4 + 9 * cout_p * C * 2 + cout_p * 4        # resident params
                + C * L * 2 + 10 * cout_p * L * 4 + 2 * C * W * 2)   # live intermediates
    kernel = functools.partial(_conv_tile_kernel, W=W, TH=TH, cout=cout)
    # TODO(synk): on v7x also sweep pipeline_mode=pl.Buffered(3) on the x BlockSpec.
    out_flat = pl.pallas_call(
        kernel,
        out_shape=jax.ShapeDtypeStruct((N, cout, HW), x_nchw.dtype),
        grid_spec=pltpu.PrefetchScalarGridSpec(
            num_scalar_prefetch=0,
            grid=(N, n_tiles),
            in_specs=[
                pl.BlockSpec((1, C, L), lambda n, r: (n, 0, r)),
                pl.BlockSpec((1, 1, C, W),
                             lambda n, r: (n, jnp.maximum(r - 1, 0), 0, 0)),
                pl.BlockSpec((1, 1, C, W),
                             lambda n, r: (n, jnp.minimum(r + 1, n_tiles - 1), 0, 0)),
                pl.BlockSpec((1, C, 2), lambda n, r: (n, 0, 0)),
                pl.BlockSpec((9 * cout_p, C), lambda n, r: (0, 0)),
                pl.BlockSpec((cout_p, 1), lambda n, r: (0, 0)),
            ],
            out_specs=pl.BlockSpec((1, cout, L), lambda n, r: (n, 0, r)),
        ),
        compiler_params=pltpu.CompilerParams(
            dimension_semantics=("parallel", "parallel"),
            vmem_limit_bytes=_vmem_limit(main_est),
        ),
    )(x_flat, tile_last, tile_first, ss, w_packed, bias2)

    return out_flat.reshape(N, cout, H, W)


# --------------------------------------------------------------------------------------
# Pure-JAX reference
# --------------------------------------------------------------------------------------
def reference_forward(x_nchw, gamma, beta, w_oihw, bias):
    N, C, H, W = x_nchw.shape
    cg = C // GROUPS
    xr = x_nchw.reshape(N, GROUPS, cg, H, W)
    mean = jnp.mean(xr, axis=(2, 3, 4), keepdims=True)
    var = jnp.var(xr, axis=(2, 3, 4), keepdims=True)
    xn = (xr - mean) / jnp.sqrt(var + EPS)
    xn = xn.reshape(N, C, H, W) * gamma[None, :, None, None] + beta[None, :, None, None]
    h = xn * jax.nn.sigmoid(xn)
    out = lax.conv_general_dilated(
        h, w_oihw, window_strides=(1, 1), padding=((1, 1), (1, 1)),
        dimension_numbers=("NCHW", "OIHW", "NCHW"))
    return out + bias[None, :, None, None]


if __name__ == "__main__":
    # Small shapes consistent with the module: GroupNorm(32) requires Cin % 32 == 0.
    N, Cin, Cout, H, W = 2, 64, 4, 16, 16

    key = jax.random.PRNGKey(0)
    kx, kg, kb, kw, kc = jax.random.split(key, 5)
    x = jax.random.normal(kx, (N, Cin, H, W), jnp.float32)
    gamma = 1.0 + 0.1 * jax.random.normal(kg, (Cin,), jnp.float32)
    beta = 0.1 * jax.random.normal(kb, (Cin,), jnp.float32)
    w = 0.1 * jax.random.normal(kw, (Cout, Cin, 3, 3), jnp.float32)   # OIHW
    bias = 0.1 * jax.random.normal(kc, (Cout,), jnp.float32)

    ref = jax.block_until_ready(reference_forward(x, gamma, beta, w, bias))

    # Conv + SiLU run in bf16 on the MXU/EUP (f32 accumulate) against an all-f32
    # reference, so the tolerance reflects the intended bf16 precision trade-off.
    # 1) Row-tiled path (2 row tiles of 8 rows each -> exercises halos, clamped index
    #    maps, boundary masks, megacore-parallel grid).
    out_tiled = jax.block_until_ready(
        jax.jit(functools.partial(unet_output_layer, row_tile=8))(x, gamma, beta, w, bias))
    assert out_tiled.shape == (N, Cout, H, W), out_tiled.shape
    assert jnp.allclose(out_tiled, ref, rtol=4e-2, atol=4e-2), \
        float(jnp.max(jnp.abs(out_tiled - ref)))

    # 2) Auto tile-size path (falls back to whole-image tiles at this small resolution).
    out_auto = jax.block_until_ready(
        jax.jit(unet_output_layer)(x, gamma, beta, w, bias))
    assert out_auto.shape == (N, Cout, H, W), out_auto.shape
    assert jnp.allclose(out_auto, ref, rtol=4e-2, atol=4e-2), \
        float(jnp.max(jnp.abs(out_auto - ref)))

    print("KERNEL_OK")
</pallas_src>

<mosaic_0001>
module attributes {stable_mosaic.version = 11 : i64} {
  func.func @_gn_stats_kernel(%arg0: i32, %arg1: i32, %arg2: memref<1x64x128xf32, #tpu.memory_space<vmem>>, %arg3: memref<64x1xf32, #tpu.memory_space<vmem>>, %arg4: memref<64x1xf32, #tpu.memory_space<vmem>>, %arg5: memref<32x64xf32, #tpu.memory_space<vmem>>, %arg6: memref<64x32xf32, #tpu.memory_space<vmem>>, %arg7: memref<1x64x2xf32, #tpu.memory_space<vmem>>, %arg8: memref<64x2xf32, #tpu.memory_space<vmem>>) attributes {dimension_semantics = [#tpu.dimension_semantics<parallel>, #tpu.dimension_semantics<arbitrary>], iteration_bounds = array<i64: 2, 2>, scalar_prefetch = 0 : i64, scratch_operands = 1 : i64, tpu.core_type = #tpu.core_type<tc>, window_params = [{transform_indices = @transform_0, window_bounds = array<i64: 1, 64, 128>}, {pipeline_mode = #tpu.pipeline_mode<synchronous>, transform_indices = @transform_1, window_bounds = array<i64: 64, 1>}, {pipeline_mode = #tpu.pipeline_mode<synchronous>, transform_indices = @transform_2, window_bounds = array<i64: 64, 1>}, {pipeline_mode = #tpu.pipeline_mode<synchronous>, transform_indices = @transform_3, window_bounds = array<i64: 32, 64>}, {pipeline_mode = #tpu.pipeline_mode<synchronous>, transform_indices = @transform_4, window_bounds = array<i64: 64, 32>}, {transform_indices = @transform_5, window_bounds = array<i64: 1, 64, 2>}]} {
    %c0_i32 = arith.constant 0 : i32
    %0 = arith.cmpi eq, %arg1, %c0_i32 : i32
    %1 = arith.extui %0 : i1 to i32
    %c0_i32_0 = arith.constant 0 : i32
    %2 = arith.cmpi ne, %1, %c0_i32_0 : i32
    scf.if %2 {
      %cst_9 = arith.constant 0.000000e+00 : f32
      %17 = vector.broadcast %cst_9 : f32 to vector<64x2xf32>
      %c0_10 = arith.constant 0 : index
      %c0_11 = arith.constant 0 : index
      %18 = vector.load %arg8[%c0_10, %c0_11] : memref<64x2xf32, #tpu.memory_space<vmem>>, vector<64x2xf32>
      tpu.vector_store %arg8[%c0_10, %c0_11], %17 {strides = array<i32>} : memref<64x2xf32, #tpu.memory_space<vmem>>, vector<64x2xf32>,
    } else {
    }
    %c0 = arith.constant 0 : index
    %c0_1 = arith.constant 0 : index
    %c0_2 = arith.constant 0 : index
    %3 = vector.load %arg2[%c0, %c0_1, %c0_2] : memref<1x64x128xf32, #tpu.memory_space<vmem>>, vector<1x64x128xf32>
    %4 = vector.shape_cast %3 : vector<1x64x128xf32> to vector<64x128xf32>
    %cst = arith.constant dense<0.000000e+00> : vector<64xf32>
    %5 = vector.multi_reduction <add>, %4, %cst [1] : vector<64x128xf32> to vector<64xf32>
    %6 = vector.shape_cast %5 : vector<64xf32> to vector<64x1xf32>
    %7 = arith.mulf %4, %4 : vector<64x128xf32>
    %cst_3 = arith.constant dense<0.000000e+00> : vector<64xf32>
    %8 = vector.multi_reduction <add>, %7, %cst_3 [1] : vector<64x128xf32> to vector<64xf32>
    %9 = vector.shape_cast %8 : vector<64xf32> to vector<64x1xf32>
    %c0_4 = arith.constant 0 : index
    %c0_5 = arith.constant 0 : index
    %10 = vector.load %arg8[%c0_4, %c0_5] : memref<64x2xf32, #tpu.memory_space<vmem>>, vector<64x2xf32>
    %11 = tpu.concatenate %6, %9 in 1 : vector<64x1xf32>, vector<64x1xf32> -> vector<64x2xf32>
    %12 = arith.addf %10, %11 : vector<64x2xf32>
    %c0_6 = arith.constant 0 : index
    %c0_7 = arith.constant 0 : index
    %13 = vector.load %arg8[%c0_6, %c0_7] : memref<64x2xf32, #tpu.memory_space<vmem>>, vector<64x2xf32>
    tpu.vector_store %arg8[%c0_6, %c0_7], %12 {strides = array<i32>} : memref<64x2xf32, #tpu.memory_space<vmem>>, vector<64x2xf32>,
    %c1_i32 = arith.constant 1 : i32
    %14 = arith.cmpi eq, %arg1, %c1_i32 : i32
    %15 = arith.extui %14 : i1 to i32
    %c0_i32_8 = arith.constant 0 : i32
    %16 = arith.cmpi ne, %15, %c0_i32_8 : i32
    scf.if %16 {
      %c0_9 = arith.constant 0 : index
      %c0_10 = arith.constant 0 : index
      %17 = vector.load %arg5[%c0_9, %c0_10] : memref<32x64xf32, #tpu.memory_space<vmem>>, vector<32x64xf32>
      %c0_11 = arith.constant 0 : index
      %c0_12 = arith.constant 0 : index
      %18 = vector.load %arg8[%c0_11, %c0_12] : memref<64x2xf32, #tpu.memory_space<vmem>>, vector<64x2xf32>
      %cst_13 = arith.constant dense<0.000000e+00> : vector<32x2xf32>
      %19 = tpu.matmul %17, %18, %cst_13 {dimension_numbers = #tpu.dot_dimension_numbers<[1], [0], [0], [1], [0, 0, 1, 1], [], []>} : vector<32x64xf32>, vector<64x2xf32>, vector<32x2xf32> -> vector<32x2xf32>
      %cst_14 = arith.constant 5.120000e+02 : f32
      %20 = vector.broadcast %cst_14 : f32 to vector<32x2xf32>
      %21 = arith.divf %19, %20 : vector<32x2xf32>
      %22 = vector.extract_strided_slice %21 {offsets = [0, 0], sizes = [32, 1], strides = [1, 1]} : vector<32x2xf32> to vector<32x1xf32>
      %23 = vector.extract_strided_slice %21 {offsets = [0, 1], sizes = [32, 1], strides = [1, 1]} : vector<32x2xf32> to vector<32x1xf32>
      %24 = arith.mulf %22, %22 : vector<32x1xf32>
      %25 = arith.subf %23, %24 : vector<32x1xf32>
      %cst_15 = arith.constant 0.000000e+00 : f32
      %26 = vector.broadcast %cst_15 : f32 to vector<32x1xf32>
      %27 = arith.maximumf %25, %26 : vector<32x1xf32>
      %c0_16 = arith.constant 0 : index
      %c0_17 = arith.constant 0 : index
      %28 = vector.load %arg6[%c0_16, %c0_17] : memref<64x32xf32, #tpu.memory_space<vmem>>, vector<64x32xf32>
      %29 = tpu.concatenate %22, %27 in 1 : vector<32x1xf32>, vector<32x1xf32> -> vector<32x2xf32>
      %cst_18 = arith.constant dense<0.000000e+00> : vector<64x2xf32>
      %30 = tpu.matmul %28, %29, %cst_18 {dimension_numbers = #tpu.dot_dimension_numbers<[1], [0], [0], [1], [0, 0, 1, 1], [], []>} : vector<64x32xf32>, vector<32x2xf32>, vector<64x2xf32> -> vector<64x2xf32>
      %31 = vector.extract_strided_slice %30 {offsets = [0, 1], sizes = [64, 1], strides = [1, 1]} : vector<64x2xf32> to vector<64x1xf32>
      %cst_19 = arith.constant 9.99999974E-6 : f32
      %32 = vector.broadcast %cst_19 : f32 to vector<64x1xf32>
      %33 = arith.addf %31, %32 : vector<64x1xf32>
      %34 = math.rsqrt %33 : vector<64x1xf32>
      %c0_20 = arith.constant 0 : index
      %c0_21 = arith.constant 0 : index
      %35 = vector.load %arg3[%c0_20, %c0_21] : memref<64x1xf32, #tpu.memory_space<vmem>>, vector<64x1xf32>
      %36 = arith.mulf %34, %35 : vector<64x1xf32>
      %c0_22 = arith.constant 0 : index
      %c0_23 = arith.constant 0 : index
      %37 = vector.load %arg4[%c0_22, %c0_23] : memref<64x1xf32, #tpu.memory_space<vmem>>, vector<64x1xf32>
      %38 = vector.extract_strided_slice %30 {offsets = [0, 0], sizes = [64, 1], strides = [1, 1]} : vector<64x2xf32> to vector<64x1xf32>
      %39 = arith.mulf %38, %36 : vector<64x1xf32>
      %40 = arith.subf %37, %39 : vector<64x1xf32>
      %41 = tpu.concatenate %36, %40 in 1 : vector<64x1xf32>, vector<64x1xf32> -> vector<64x2xf32>
      %c0_24 = arith.constant 0 : index
      %c0_25 = arith.constant 0 : index
      %c0_26 = arith.constant 0 : index
      %42 = vector.load %arg7[%c0_24, %c0_25, %c0_26] : memref<1x64x2xf32, #tpu.memory_space<vmem>>, vector<1x64x2xf32>
      %43 = vector.shape_cast %42 : vector<1x64x2xf32> to vector<64x2xf32>
      %44 = vector.shape_cast %41 : vector<64x2xf32> to vector<1x64x2xf32>
      tpu.vector_store %arg7[%c0_24, %c0_25, %c0_26], %44 {strides = array<i32>} : memref<1x64x2xf32, #tpu.memory_space<vmem>>, vector<1x64x2xf32>,
    } else {
    }
    return
  }
  func.func @transform_0(%arg0: i32, %arg1: i32) -> (i32, i32, i32) {
    %c0_i32 = arith.constant 0 : i32
    %c0_i32_0 = arith.constant 0 : i32
    return %arg0, %c0_i32, %arg1 : i32, i32, i32
  }
  func.func @transform_1(%arg0: i32, %arg1: i32) -> (i32, i32) {
    %c0_i32 = arith.constant 0 : i32
    %c0_i32_0 = arith.constant 0 : i32
    %c0_i32_1 = arith.constant 0 : i32
    return %c0_i32, %c0_i32_0 : i32, i32
  }
  func.func @transform_2(%arg0: i32, %arg1: i32) -> (i32, i32) {
    %c0_i32 = arith.constant 0 : i32
    %c0_i32_0 = arith.constant 0 : i32
    %c0_i32_1 = arith.constant 0 : i32
    return %c0_i32, %c0_i32_0 : i32, i32
  }
  func.func @transform_3(%arg0: i32, %arg1: i32) -> (i32, i32) {
    %c0_i32 = arith.constant 0 : i32
    %c0_i32_0 = arith.constant 0 : i32
    %c0_i32_1 = arith.constant 0 : i32
    return %c0_i32, %c0_i32_0 : i32, i32
  }
  func.func @transform_4(%arg0: i32, %arg1: i32) -> (i32, i32) {
    %c0_i32 = arith.constant 0 : i32
    %c0_i32_0 = arith.constant 0 : i32
    %c0_i32_1 = arith.constant 0 : i32
    return %c0_i32, %c0_i32_0 : i32, i32
  }
  func.func @transform_5(%arg0: i32, %arg1: i32) -> (i32, i32, i32) {
    %c0_i32 = arith.constant 0 : i32
    %c0_i32_0 = arith.constant 0 : i32
    %c0_i32_1 = arith.constant 0 : i32
    return %arg0, %c0_i32, %c0_i32_0 : i32, i32, i32
  }
}

module attributes {stable_mosaic.version = 11 : i64} {
  func.func @_conv_tile_kernel(%arg0: i32, %arg1: i32, %arg2: memref<1x64x128xf32, #tpu.memory_space<vmem>>, %arg3: memref<1x1x64x16xf32, #tpu.memory_space<vmem>>, %arg4: memref<1x1x64x16xf32, #tpu.memory_space<vmem>>, %arg5: memref<1x64x2xf32, #tpu.memory_space<vmem>>, %arg6: memref<72x64xbf16, #tpu.memory_space<vmem>>, %arg7: memref<8x1xf32, #tpu.memory_space<vmem>>, %arg8: memref<1x4x128xf32, #tpu.memory_space<vmem>>) attributes {dimension_semantics = [#tpu.dimension_semantics<parallel>, #tpu.dimension_semantics<parallel>], iteration_bounds = array<i64: 2, 2>, scalar_prefetch = 0 : i64, scratch_operands = 0 : i64, tpu.core_type = #tpu.core_type<tc>, window_params = [{transform_indices = @transform_0, window_bounds = array<i64: 1, 64, 128>}, {transform_indices = @transform_1, window_bounds = array<i64: 1, 1, 64, 16>}, {transform_indices = @transform_2, window_bounds = array<i64: 1, 1, 64, 16>}, {transform_indices = @transform_3, window_bounds = array<i64: 1, 64, 2>}, {pipeline_mode = #tpu.pipeline_mode<synchronous>, transform_indices = @transform_4, window_bounds = array<i64: 72, 64>}, {pipeline_mode = #tpu.pipeline_mode<synchronous>, transform_indices = @transform_5, window_bounds = array<i64: 8, 1>}, {transform_indices = @transform_6, window_bounds = array<i64: 1, 4, 128>}]} {
    %c0 = arith.constant 0 : index
    %c0_0 = arith.constant 0 : index
    %c0_1 = arith.constant 0 : index
    %0 = vector.load %arg5[%c0, %c0_0, %c0_1] : memref<1x64x2xf32, #tpu.memory_space<vmem>>, vector<1x64x1xf32>
    %1 = vector.shape_cast %0 : vector<1x64x1xf32> to vector<64x1xf32>
    %c0_2 = arith.constant 0 : index
    %c0_3 = arith.constant 0 : index
    %c1 = arith.constant 1 : index
    %2 = vector.load %arg5[%c0_2, %c0_3, %c1] : memref<1x64x2xf32, #tpu.memory_space<vmem>>, vector<1x64x1xf32>
    %3 = vector.shape_cast %2 : vector<1x64x1xf32> to vector<64x1xf32>
    %c0_4 = arith.constant 0 : index
    %c0_5 = arith.constant 0 : index
    %c0_6 = arith.constant 0 : index
    %4 = vector.load %arg2[%c0_4, %c0_5, %c0_6] : memref<1x64x128xf32, #tpu.memory_space<vmem>>, vector<1x64x128xf32>
    %5 = vector.shape_cast %4 : vector<1x64x128xf32> to vector<64x128xf32>
    %6 = vector.broadcast %1 : vector<64x1xf32> to vector<64x128xf32>
    %7 = arith.mulf %5, %6 : vector<64x128xf32>
    %8 = vector.broadcast %3 : vector<64x1xf32> to vector<64x128xf32>
    %9 = arith.addf %7, %8 : vector<64x128xf32>
    %10 = arith.truncf %9 : vector<64x128xf32> to vector<64x128xbf16>
    %11 = arith.negf %10 : vector<64x128xbf16>
    %12 = math.exp %11 : vector<64x128xbf16>
    %cst = arith.constant 1.000000e+00 : bf16
    %13 = vector.broadcast %cst : bf16 to vector<64x128xbf16>
    %14 = arith.addf %13, %12 : vector<64x128xbf16>
    %15 = arith.divf %13, %14 : vector<64x128xbf16>
    %16 = arith.mulf %10, %15 : vector<64x128xbf16>
    %c0_7 = arith.constant 0 : index
    %c0_8 = arith.constant 0 : index
    %c0_9 = arith.constant 0 : index
    %c0_10 = arith.constant 0 : index
    %17 = vector.load %arg3[%c0_7, %c0_8, %c0_9, %c0_10] : memref<1x1x64x16xf32, #tpu.memory_space<vmem>>, vector<1x1x64x16xf32>
    %18 = vector.shape_cast %17 : vector<1x1x64x16xf32> to vector<64x16xf32>
    %19 = vector.broadcast %1 : vector<64x1xf32> to vector<64x16xf32>
    %20 = arith.mulf %18, %19 : vector<64x16xf32>
    %21 = vector.broadcast %3 : vector<64x1xf32> to vector<64x16xf32>
    %22 = arith.addf %20, %21 : vector<64x16xf32>
    %23 = arith.truncf %22 : vector<64x16xf32> to vector<64x16xbf16>
    %24 = arith.negf %23 : vector<64x16xbf16>
    %25 = math.exp %24 : vector<64x16xbf16>
    %cst_11 = arith.constant 1.000000e+00 : bf16
    %26 = vector.broadcast %cst_11 : bf16 to vector<64x16xbf16>
    %27 = arith.addf %26, %25 : vector<64x16xbf16>
    %28 = arith.divf %26, %27 : vector<64x16xbf16>
    %29 = arith.mulf %23, %28 : vector<64x16xbf16>
    %c0_12 = arith.constant 0 : index
    %c0_13 = arith.constant 0 : index
    %c0_14 = arith.constant 0 : index
    %c0_15 = arith.constant 0 : index
    %30 = vector.load %arg4[%c0_12, %c0_13, %c0_14, %c0_15] : memref<1x1x64x16xf32, #tpu.memory_space<vmem>>, vector<1x1x64x16xf32>
    %31 = vector.shape_cast %30 : vector<1x1x64x16xf32> to vector<64x16xf32>
    %32 = vector.broadcast %1 : vector<64x1xf32> to vector<64x16xf32>
    %33 = arith.mulf %31, %32 : vector<64x16xf32>
    %34 = vector.broadcast %3 : vector<64x1xf32> to vector<64x16xf32>
    %35 = arith.addf %33, %34 : vector<64x16xf32>
    %36 = arith.truncf %35 : vector<64x16xf32> to vector<64x16xbf16>
    %37 = arith.negf %36 : vector<64x16xbf16>
    %38 = math.exp %37 : vector<64x16xbf16>
    %cst_16 = arith.constant 1.000000e+00 : bf16
    %39 = vector.broadcast %cst_16 : bf16 to vector<64x16xbf16>
    %40 = arith.addf %39, %38 : vector<64x16xbf16>
    %41 = arith.divf %39, %40 : vector<64x16xbf16>
    %42 = arith.mulf %36, %41 : vector<64x16xbf16>
    %c0_17 = arith.constant 0 : index
    %c0_18 = arith.constant 0 : index
    %43 = vector.load %arg6[%c0_17, %c0_18] : memref<72x64xbf16, #tpu.memory_space<vmem>>, vector<72x64xbf16>
    %cst_19 = arith.constant dense<0.000000e+00> : vector<72x128xf32>
    %44 = tpu.matmul %43, %16, %cst_19 {dimension_numbers = #tpu.dot_dimension_numbers<[1], [0], [0], [1], [0, 0, 1, 1], [], []>} : vector<72x64xbf16>, vector<64x128xbf16>, vector<72x128xf32> -> vector<72x128xf32>
    %cst_20 = arith.constant dense<0.000000e+00> : vector<72x16xf32>
    %45 = tpu.matmul %43, %29, %cst_20 {dimension_numbers = #tpu.dot_dimension_numbers<[1], [0], [0], [1], [0, 0, 1, 1], [], []>} : vector<72x64xbf16>, vector<64x16xbf16>, vector<72x16xf32> -> vector<72x16xf32>
    %cst_21 = arith.constant dense<0.000000e+00> : vector<72x16xf32>
    %46 = tpu.matmul %43, %42, %cst_21 {dimension_numbers = #tpu.dot_dimension_numbers<[1], [0], [0], [1], [0, 0, 1, 1], [], []>} : vector<72x64xbf16>, vector<64x16xbf16>, vector<72x16xf32> -> vector<72x16xf32>
    %47 = tpu.iota {dimensions = array<i32: 1>} : vector<1x128xi32>
    %c16_i32 = arith.constant 16 : i32
    %c0_i32 = arith.constant 0 : i32
    %48 = arith.cmpi eq, %c16_i32, %c0_i32 : i32
    %c1_i32 = arith.constant 1 : i32
    %49 = arith.select %48, %c1_i32, %c16_i32 : i32
    %50 = vector.broadcast %49 : i32 to vector<1x128xi32>
    %51 = arith.remsi %47, %50 : vector<1x128xi32>
    %c0_i32_22 = arith.constant 0 : i32
    %52 = vector.broadcast %c0_i32_22 : i32 to vector<1x128xi32>
    %53 = arith.cmpi ne, %51, %52 : vector<1x128xi32>
    %c0_i32_23 = arith.constant 0 : i32
    %54 = vector.broadcast %c0_i32_23 : i32 to vector<1x128xi32>
    %55 = arith.cmpi slt, %51, %54 : vector<1x128xi32>
    %c0_i32_24 = arith.constant 0 : i32
    %56 = arith.cmpi slt, %49, %c0_i32_24 : i32
    %57 = vector.broadcast %56 : i1 to vector<1x128xi1>
    %58 = vector.broadcast %57 : vector<1x128xi1> to vector<1x128xi1>
    %59 = arith.xori %55, %58 : vector<1x128xi1>
    %60 = arith.andi %59, %53 : vector<1x128xi1>
    %61 = vector.broadcast %49 : i32 to vector<1x128xi32>
    %62 = arith.addi %51, %61 : vector<1x128xi32>
    %63 = arith.select %60, %62, %51 : vector<1x128xi1>, vector<1x128xi32>
    %c16_i32_25 = arith.constant 16 : i32
    %64 = vector.broadcast %c16_i32_25 : i32 to vector<1x128xi32>
    %65 = arith.cmpi slt, %47, %64 : vector<1x128xi32>
    %c112_i32 = arith.constant 112 : i32
    %66 = vector.broadcast %c112_i32 : i32 to vector<1x128xi32>
    %67 = arith.cmpi sge, %47, %66 : vector<1x128xi32>
    %c1_i32_26 = arith.constant 1 : i32
    %68 = vector.broadcast %c1_i32_26 : i32 to vector<1x128xi32>
    %69 = arith.cmpi sge, %63, %68 : vector<1x128xi32>
    %c14_i32 = arith.constant 14 : i32
    %70 = vector.broadcast %c14_i32 : i32 to vector<1x128xi32>
    %71 = arith.cmpi sle, %63, %70 : vector<1x128xi32>
    %c0_i32_27 = arith.constant 0 : i32
    %72 = arith.cmpi eq, %arg1, %c0_i32_27 : i32
    %c1_i32_28 = arith.constant 1 : i32
    %73 = arith.cmpi eq, %arg1, %c1_i32_28 : i32
    %cst_29 = arith.constant 0.000000e+00 : f32
    %74 = vector.broadcast %cst_29 : f32 to vector<8x128xf32>
    %75 = vector.extract_strided_slice %44 {offsets = [0, 0], sizes = [8, 128], strides = [1, 1]} : vector<72x128xf32> to vector<8x128xf32>
    %c17_i32 = arith.constant 17 : i32
    %76 = tpu.dynamic_rotate %75 by %c17_i32 dim 1 : vector<8x128xf32>, i32 -> vector<8x128xf32>
    %77 = vector.extract_strided_slice %45 {offsets = [0, 0], sizes = [8, 16], strides = [1, 1]} : vector<72x16xf32> to vector<8x16xf32>
    %c1_i32_30 = arith.constant 1 : i32
    %78 = tpu.dynamic_rotate %77 by %c1_i32_30 dim 1 : vector<8x16xf32>, i32 -> vector<8x16xf32>
    %79 = tpu.concatenate %78, %78, %78, %78, %78, %78, %78, %78 in 1 : vector<8x16xf32>, vector<8x16xf32>, vector<8x16xf32>, vector<8x16xf32>, vector<8x16xf32>, vector<8x16xf32>, vector<8x16xf32>, vector<8x16xf32> -> vector<8x128xf32>
    %80 = vector.shape_cast %65 : vector<1x128xi1> to vector<1x128xi1>
    %81 = vector.broadcast %80 : vector<1x128xi1> to vector<8x128xi1>
    %82 = arith.select %81, %79, %76 : vector<8x128xi1>, vector<8x128xf32>
    %83 = vector.broadcast %72 : i1 to vector<1x128xi1>
    %84 = arith.andi %65, %83 : vector<1x128xi1>
    %cst_31 = arith.constant 0.000000e+00 : f32
    %85 = vector.shape_cast %84 : vector<1x128xi1> to vector<1x128xi1>
    %86 = vector.broadcast %85 : vector<1x128xi1> to vector<8x128xi1>
    %87 = vector.broadcast %cst_31 : f32 to vector<8x128xf32>
    %88 = arith.select %86, %87, %82 : vector<8x128xi1>, vector<8x128xf32>
    %cst_32 = arith.constant 0.000000e+00 : f32
    %89 = vector.shape_cast %69 : vector<1x128xi1> to vector<1x128xi1>
    %90 = vector.broadcast %89 : vector<1x128xi1> to vector<8x128xi1>
    %91 = vector.broadcast %cst_32 : f32 to vector<8x128xf32>
    %92 = arith.select %90, %88, %91 : vector<8x128xi1>, vector<8x128xf32>
    %93 = arith.addf %74, %92 : vector<8x128xf32>
    %94 = vector.extract_strided_slice %44 {offsets = [8, 0], sizes = [8, 128], strides = [1, 1]} : vector<72x128xf32> to vector<8x128xf32>
    %c16_i32_33 = arith.constant 16 : i32
    %95 = tpu.dynamic_rotate %94 by %c16_i32_33 dim 1 : vector<8x128xf32>, i32 -> vector<8x128xf32>
    %96 = vector.extract_strided_slice %45 {offsets = [8, 0], sizes = [8, 16], strides = [1, 1]} : vector<72x16xf32> to vector<8x16xf32>
    %97 = tpu.concatenate %96, %96, %96, %96, %96, %96, %96, %96 in 1 : vector<8x16xf32>, vector<8x16xf32>, vector<8x16xf32>, vector<8x16xf32>, vector<8x16xf32>, vector<8x16xf32>, vector<8x16xf32>, vector<8x16xf32> -> vector<8x128xf32>
    %98 = vector.shape_cast %65 : vector<1x128xi1> to vector<1x128xi1>
    %99 = vector.broadcast %98 : vector<1x128xi1> to vector<8x128xi1>
    %100 = arith.select %99, %97, %95 : vector<8x128xi1>, vector<8x128xf32>
    %101 = vector.broadcast %72 : i1 to vector<1x128xi1>
    %102 = arith.andi %65, %101 : vector<1x128xi1>
    %cst_34 = arith.constant 0.000000e+00 : f32
    %103 = vector.shape_cast %102 : vector<1x128xi1> to vector<1x128xi1>
    %104 = vector.broadcast %103 : vector<1x128xi1> to vector<8x128xi1>
    %105 = vector.broadcast %cst_34 : f32 to vector<8x128xf32>
    %106 = arith.select %104, %105, %100 : vector<8x128xi1>, vector<8x128xf32>
    %107 = arith.addf %93, %106 : vector<8x128xf32>
    %108 = vector.extract_strided_slice %44 {offsets = [16, 0], sizes = [8, 128], strides = [1, 1]} : vector<72x128xf32> to vector<8x128xf32>
    %c15_i32 = arith.constant 15 : i32
    %109 = tpu.dynamic_rotate %108 by %c15_i32 dim 1 : vector<8x128xf32>, i32 -> vector<8x128xf32>
    %110 = vector.extract_strided_slice %45 {offsets = [16, 0], sizes = [8, 16], strides = [1, 1]} : vector<72x16xf32> to vector<8x16xf32>
    %c15_i32_35 = arith.constant 15 : i32
    %111 = tpu.dynamic_rotate %110 by %c15_i32_35 dim 1 : vector<8x16xf32>, i32 -> vector<8x16xf32>
    %112 = tpu.concatenate %111, %111, %111, %111, %111, %111, %111, %111 in 1 : vector<8x16xf32>, vector<8x16xf32>, vector<8x16xf32>, vector<8x16xf32>, vector<8x16xf32>, vector<8x16xf32>, vector<8x16xf32>, vector<8x16xf32> -> vector<8x128xf32>
    %113 = vector.shape_cast %65 : vector<1x128xi1> to vector<1x128xi1>
    %114 = vector.broadcast %113 : vector<1x128xi1> to vector<8x128xi1>
    %115 = arith.select %114, %112, %109 : vector<8x128xi1>, vector<8x128xf32>
    %116 = vector.broadcast %72 : i1 to vector<1x128xi1>
    %117 = arith.andi %65, %116 : vector<1x128xi1>
    %cst_36 = arith.constant 0.000000e+00 : f32
    %118 = vector.shape_cast %117 : vector<1x128xi1> to vector<1x128xi1>
    %119 = vector.broadcast %118 : vector<1x128xi1> to vector<8x128xi1>
    %120 = vector.broadcast %cst_36 : f32 to vector<8x128xf32>
    %121 = arith.select %119, %120, %115 : vector<8x128xi1>, vector<8x128xf32>
    %cst_37 = arith.constant 0.000000e+00 : f32
    %122 = vector.shape_cast %71 : vector<1x128xi1> to vector<1x128xi1>
    %123 = vector.broadcast %122 : vector<1x128xi1> to vector<8x128xi1>
    %124 = vector.broadcast %cst_37 : f32 to vector<8x128xf32>
    %125 = arith.select %123, %121, %124 : vector<8x128xi1>, vector<8x128xf32>
    %126 = arith.addf %107, %125 : vector<8x128xf32>
    %127 = vector.extract_strided_slice %44 {offsets = [24, 0], sizes = [8, 128], strides = [1, 1]} : vector<72x128xf32> to vector<8x128xf32>
    %c1_i32_38 = arith.constant 1 : i32
    %128 = tpu.dynamic_rotate %127 by %c1_i32_38 dim 1 : vector<8x128xf32>, i32 -> vector<8x128xf32>
    %cst_39 = arith.constant 0.000000e+00 : f32
    %129 = vector.shape_cast %69 : vector<1x128xi1> to vector<1x128xi1>
    %130 = vector.broadcast %129 : vector<1x128xi1> to vector<8x128xi1>
    %131 = vector.broadcast %cst_39 : f32 to vector<8x128xf32>
    %132 = arith.select %130, %128, %131 : vector<8x128xi1>, vector<8x128xf32>
    %133 = arith.addf %126, %132 : vector<8x128xf32>
    %134 = vector.extract_strided_slice %44 {offsets = [32, 0], sizes = [8, 128], strides = [1, 1]} : vector<72x128xf32> to vector<8x128xf32>
    %135 = arith.addf %133, %134 : vector<8x128xf32>
    %136 = vector.extract_strided_slice %44 {offsets = [40, 0], sizes = [8, 128], strides = [1, 1]} : vector<72x128xf32> to vector<8x128xf32>
    %c127_i32 = arith.constant 127 : i32
    %137 = tpu.dynamic_rotate %136 by %c127_i32 dim 1 : vector<8x128xf32>, i32 -> vector<8x128xf32>
    %cst_40 = arith.constant 0.000000e+00 : f32
    %138 = vector.shape_cast %71 : vector<1x128xi1> to vector<1x128xi1>
    %139 = vector.broadcast %138 : vector<1x128xi1> to vector<8x128xi1>
    %140 = vector.broadcast %cst_40 : f32 to vector<8x128xf32>
    %141 = arith.select %139, %137, %140 : vector<8x128xi1>, vector<8x128xf32>
    %142 = arith.addf %135, %141 : vector<8x128xf32>
    %143 = vector.extract_strided_slice %44 {offsets = [48, 0], sizes = [8, 128], strides = [1, 1]} : vector<72x128xf32> to vector<8x128xf32>
    %c113_i32 = arith.constant 113 : i32
    %144 = tpu.dynamic_rotate %143 by %c113_i32 dim 1 : vector<8x128xf32>, i32 -> vector<8x128xf32>
    %145 = vector.extract_strided_slice %46 {offsets = [48, 0], sizes = [8, 16], strides = [1, 1]} : vector<72x16xf32> to vector<8x16xf32>
    %c1_i32_41 = arith.constant 1 : i32
    %146 = tpu.dynamic_rotate %145 by %c1_i32_41 dim 1 : vector<8x16xf32>, i32 -> vector<8x16xf32>
    %147 = tpu.concatenate %146, %146, %146, %146, %146, %146, %146, %146 in 1 : vector<8x16xf32>, vector<8x16xf32>, vector<8x16xf32>, vector<8x16xf32>, vector<8x16xf32>, vector<8x16xf32>, vector<8x16xf32>, vector<8x16xf32> -> vector<8x128xf32>
    %148 = vector.shape_cast %67 : vector<1x128xi1> to vector<1x128xi1>
    %149 = vector.broadcast %148 : vector<1x128xi1> to vector<8x128xi1>
    %150 = arith.select %149, %147, %144 : vector<8x128xi1>, vector<8x128xf32>
    %151 = vector.broadcast %73 : i1 to vector<1x128xi1>
    %152 = arith.andi %67, %151 : vector<1x128xi1>
    %cst_42 = arith.constant 0.000000e+00 : f32
    %153 = vector.shape_cast %152 : vector<1x128xi1> to vector<1x128xi1>
    %154 = vector.broadcast %153 : vector<1x128xi1> to vector<8x128xi1>
    %155 = vector.broadcast %cst_42 : f32 to vector<8x128xf32>
    %156 = arith.select %154, %155, %150 : vector<8x128xi1>, vector<8x128xf32>
    %cst_43 = arith.constant 0.000000e+00 : f32
    %157 = vector.shape_cast %69 : vector<1x128xi1> to vector<1x128xi1>
    %158 = vector.broadcast %157 : vector<1x128xi1> to vector<8x128xi1>
    %159 = vector.broadcast %cst_43 : f32 to vector<8x128xf32>
    %160 = arith.select %158, %156, %159 : vector<8x128xi1>, vector<8x128xf32>
    %161 = arith.addf %142, %160 : vector<8x128xf32>
    %162 = vector.extract_strided_slice %44 {offsets = [56, 0], sizes = [8, 128], strides = [1, 1]} : vector<72x128xf32> to vector<8x128xf32>
    %c112_i32_44 = arith.constant 112 : i32
    %163 = tpu.dynamic_rotate %162 by %c112_i32_44 dim 1 : vector<8x128xf32>, i32 -> vector<8x128xf32>
    %164 = vector.extract_strided_slice %46 {offsets = [56, 0], sizes = [8, 16], strides = [1, 1]} : vector<72x16xf32> to vector<8x16xf32>
    %165 = tpu.concatenate %164, %164, %164, %164, %164, %164, %164, %164 in 1 : vector<8x16xf32>, vector<8x16xf32>, vector<8x16xf32>, vector<8x16xf32>, vector<8x16xf32>, vector<8x16xf32>, vector<8x16xf32>, vector<8x16xf32> -> vector<8x128xf32>
    %166 = vector.shape_cast %67 : vector<1x128xi1> to vector<1x128xi1>
    %167 = vector.broadcast %166 : vector<1x128xi1> to vector<8x128xi1>
    %168 = arith.select %167, %165, %163 : vector<8x128xi1>, vector<8x128xf32>
    %169 = vector.broadcast %73 : i1 to vector<1x128xi1>
    %170 = arith.andi %67, %169 : vector<1x128xi1>
    %cst_45 = arith.constant 0.000000e+00 : f32
    %171 = vector.shape_cast %170 : vector<1x128xi1> to vector<1x128xi1>
    %172 = vector.broadcast %171 : vector<1x128xi1> to vector<8x128xi1>
    %173 = vector.broadcast %cst_45 : f32 to vector<8x128xf32>
    %174 = arith.select %172, %173, %168 : vector<8x128xi1>, vector<8x128xf32>
    %175 = arith.addf %161, %174 : vector<8x128xf32>
    %176 = vector.extract_strided_slice %44 {offsets = [64, 0], sizes = [8, 128], strides = [1, 1]} : vector<72x128xf32> to vector<8x128xf32>
    %c111_i32 = arith.constant 111 : i32
    %177 = tpu.dynamic_rotate %176 by %c111_i32 dim 1 : vector<8x128xf32>, i32 -> vector<8x128xf32>
    %178 = vector.extract_strided_slice %46 {offsets = [64, 0], sizes = [8, 16], strides = [1, 1]} : vector<72x16xf32> to vector<8x16xf32>
    %c15_i32_46 = arith.constant 15 : i32
    %179 = tpu.dynamic_rotate %178 by %c15_i32_46 dim 1 : vector<8x16xf32>, i32 -> vector<8x16xf32>
    %180 = tpu.concatenate %179, %179, %179, %179, %179, %179, %179, %179 in 1 : vector<8x16xf32>, vector<8x16xf32>, vector<8x16xf32>, vector<8x16xf32>, vector<8x16xf32>, vector<8x16xf32>, vector<8x16xf32>, vector<8x16xf32> -> vector<8x128xf32>
    %181 = vector.shape_cast %67 : vector<1x128xi1> to vector<1x128xi1>
    %182 = vector.broadcast %181 : vector<1x128xi1> to vector<8x128xi1>
    %183 = arith.select %182, %180, %177 : vector<8x128xi1>, vector<8x128xf32>
    %184 = vector.broadcast %73 : i1 to vector<1x128xi1>
    %185 = arith.andi %67, %184 : vector<1x128xi1>
    %cst_47 = arith.constant 0.000000e+00 : f32
    %186 = vector.shape_cast %185 : vector<1x128xi1> to vector<1x128xi1>
    %187 = vector.broadcast %186 : vector<1x128xi1> to vector<8x128xi1>
    %188 = vector.broadcast %cst_47 : f32 to vector<8x128xf32>
    %189 = arith.select %187, %188, %183 : vector<8x128xi1>, vector<8x128xf32>
    %cst_48 = arith.constant 0.000000e+00 : f32
    %190 = vector.shape_cast %71 : vector<1x128xi1> to vector<1x128xi1>
    %191 = vector.broadcast %190 : vector<1x128xi1> to vector<8x128xi1>
    %192 = vector.broadcast %cst_48 : f32 to vector<8x128xf32>
    %193 = arith.select %191, %189, %192 : vector<8x128xi1>, vector<8x128xf32>
    %194 = arith.addf %175, %193 : vector<8x128xf32>
    %c0_49 = arith.constant 0 : index
    %c0_50 = arith.constant 0 : index
    %195 = vector.load %arg7[%c0_49, %c0_50] : memref<8x1xf32, #tpu.memory_space<vmem>>, vector<8x1xf32>
    %196 = vector.broadcast %195 : vector<8x1xf32> to vector<8x128xf32>
    %197 = arith.addf %194, %196 : vector<8x128xf32>
    %198 = vector.extract_strided_slice %197 {offsets = [0, 0], sizes = [4, 128], strides = [1, 1]} : vector<8x128xf32> to vector<4x128xf32>
    %c0_51 = arith.constant 0 : index
    %c0_52 = arith.constant 0 : index
    %c0_53 = arith.constant 0 : index
    %199 = vector.load %arg8[%c0_51, %c0_52, %c0_53] : memref<1x4x128xf32, #tpu.memory_space<vmem>>, vector<1x4x128xf32>
    %200 = vector.shape_cast %199 : vector<1x4x128xf32> to vector<4x128xf32>
    %201 = vector.shape_cast %198 : vector<4x128xf32> to vector<1x4x128xf32>
    tpu.vector_store %arg8[%c0_51, %c0_52, %c0_53], %201 {strides = array<i32>} : memref<1x4x128xf32, #tpu.memory_space<vmem>>, vector<1x4x128xf32>,
    return
  }
  func.func @transform_0(%arg0: i32, %arg1: i32) -> (i32, i32, i32) {
    %c0_i32 = arith.constant 0 : i32
    %c0_i32_0 = arith.constant 0 : i32
    return %arg0, %c0_i32, %arg1 : i32, i32, i32
  }
  func.func @transform_1(%arg0: i32, %arg1: i32) -> (i32, i32, i32, i32) {
    %c1_i32 = arith.constant 1 : i32
    %0 = arith.subi %arg1, %c1_i32 : i32
    %c0_i32 = arith.constant 0 : i32
    %1 = arith.maxsi %0, %c0_i32 : i32
    %c0_i32_0 = arith.constant 0 : i32
    %c0_i32_1 = arith.constant 0 : i32
    %c0_i32_2 = arith.constant 0 : i32
    return %arg0, %1, %c0_i32_0, %c0_i32_1 : i32, i32, i32, i32
  }
  func.func @transform_2(%arg0: i32, %arg1: i32) -> (i32, i32, i32, i32) {
    %c1_i32 = arith.constant 1 : i32
    %0 = arith.addi %arg1, %c1_i32 : i32
    %c1_i32_0 = arith.constant 1 : i32
    %1 = arith.minsi %0, %c1_i32_0 : i32
    %c0_i32 = arith.constant 0 : i32
    %c0_i32_1 = arith.constant 0 : i32
    %c0_i32_2 = arith.constant 0 : i32
    return %arg0, %1, %c0_i32, %c0_i32_1 : i32, i32, i32, i32
  }
  func.func @transform_3(%arg0: i32, %arg1: i32) -> (i32, i32, i32) {
    %c0_i32 = arith.constant 0 : i32
    %c0_i32_0 = arith.constant 0 : i32
    %c0_i32_1 = arith.constant 0 : i32
    return %arg0, %c0_i32, %c0_i32_0 : i32, i32, i32
  }
  func.func @transform_4(%arg0: i32, %arg1: i32) -> (i32, i32) {
    %c0_i32 = arith.constant 0 : i32
    %c0_i32_0 = arith.constant 0 : i32
    %c0_i32_1 = arith.constant 0 : i32
    return %c0_i32, %c0_i32_0 : i32, i32
  }
  func.func @transform_5(%arg0: i32, %arg1: i32) -> (i32, i32) {
    %c0_i32 = arith.constant 0 : i32
    %c0_i32_0 = arith.constant 0 : i32
    %c0_i32_1 = arith.constant 0 : i32
    return %c0_i32, %c0_i32_0 : i32, i32
  }
  func.func @transform_6(%arg0: i32, %arg1: i32) -> (i32, i32, i32) {
    %c0_i32 = arith.constant 0 : i32
    %c0_i32_0 = arith.constant 0 : i32
    return %arg0, %c0_i32, %arg1 : i32, i32, i32
  }
}

</mosaic_0001>

<bundles_post_ra>
// kernel: unet_output_layer.2
= control target key start
LH: loop header
LB: loop body
LE: loop exit
PB: predicated region body
PF: predicated region fallthrough
CT: control target
= control target key end

     0   :  { %s1211_s18 = smov 0   ;;  %s1213_s19 = smov 0   ;;  %s1484_s0 = inlined_call_operand.vmem [shape: f32[2,64,256], index: 0, kind: input, shape index: {}]   ;;  %s1485_s1 = inlined_call_operand.vmem [shape: f32[64,1], index: 1, kind: input, shape index: {}]   ;;  %s1486_s2 = inlined_call_operand.vmem [shape: f32[64,1], index: 2, kind: input, shape index: {}]   ;;  %s1487_s3 = inlined_call_operand.vmem [shape: f32[32,64], index: 3, kind: input, shape index: {}]   ;;  %s1488_s4 = inlined_call_operand.vmem [shape: f32[64,32], index: 4, kind: input, shape index: {}]   ;;  %s1489_s5 = inlined_call_operand.vmem [shape: f32[2,64,2], index: 5, kind: output, shape index: {}]  }
   0x1   :  { %s1215_s20 = smov 0   ;;  %s1217_s21 = smov 0  }
   0x2   :  { %s1219_s22 = smov 0   ;;  %s1221_s23 = smov 0  }
   0x3   :  { %s1223_s24 = smov 0  }
   0x4 LB: > { %s24_s25 = sadd.s32 1, %s1168_s22  ;;  %s27_s26 = sadd.s32 1, %s1172_s23  ;;  %s1176_s24 = sphi %s1223_s24, %s15_s24   ;;  %s1172_s23 = sphi %s1221_s23, %s1495_s23   ;;  %s1168_s22 = sphi %s1219_s22, %s1494_s22   ;;  %s1164_s21 = sphi %s1217_s21, %s1493_s21   ;;  %s1160_s20 = sphi %s1215_s20, %s1492_s20   ;;  %s1156_s19 = sphi %s1213_s19, %s1491_s19   ;;  %s1152_s18 = sphi %s1211_s18, %s1490_s18  }
   0x5   : > { %p25_p0 = scmp.ge.s32.totalorder %s24_s25, 2  ;;  %p43_p1 = scmp.ne.s32.totalorder %s1156_s19, %s1152_s18 }
   0x6   : > { %p44_p2 = scmp.eq.s32.totalorder %s1176_s24, 0  ;;  %s36_s30 = sadd.s32 1, %s1156_s19 }
   0x7   : > { %s1497_s25 = smov (%p25_p0, %s24_s25), 0  ;;  %s1499_s26 = smov (!%p25_p0, %s27_s26), %s1172_s23 }
   0x8   : > { %p45_p3 = por %p44_p2, %p43_p1  ;;  %p29_p4 = scmp.ge.s32.totalorder %s1499_s26, 2 }
   0x9   : > { %s32_s27 = ssub.s32 %s1168_s22, %s1497_s25  ;;  %p932_p6 = scmp.ge.s32.totalorder %s1176_s24, 4 }
   0xa   : > { %s1501_s26 = smov (%p29_p4, %s1499_s26), 0 }
   0xb   : > { %s31_s28 = ssub.s32 %s1172_s23, %s1501_s26  ;;  %191 = sbr.rel (%p932_p6) target bundleno = 28 (0x1c), region = 32 }
   0xc   : > { %s33_s29 = sor.u32 %s32_s27, %s31_s28 }
   0xd   : > { %p34_p5 = scmp.eq.s32.totalorder %s33_s29, 0 }
   0xf   : > { %s1262_s6 = scalar_select %p34_p5, %s1156_s19, %s36_s30  }
  0x12   : > { %194 = sbr.rel (!%p45_p3) target bundleno = 28 (0x1c), region = 36  ;;  %s196_s7 = sand.u32 (%p45_p3), 1, %s1156_s19  }
  0x13   : > { %s934_s8 = sshll.u32 (%p45_p3), %s1172_s23, 4  ;;  %s933_s9 = sshll.u32 (%p45_p3), %s196_s7, 6 }
  0x14   : > { %s200_s10 = sadd.s32 (%p45_p3), %s1168_s22, %s934_s8  ;;  %s198_s15 = scalar_lea.vmem (%p45_p3), [#allocation3], %s933_s9 }
  0x15   : > { %s935_s11 = sshll.u32 (%p45_p3), %s200_s10, 3 }
  0x16   : > { %s202_s14 = scalar_lea.vmem (%p45_p3), %s1484_s0, %s935_s11 }
  0x17   : > { %v244_v0 = vld [vmem:[%s202_s14] sm:$0xff] (%p45_p3)  ;;  %v246_v1 = vld [vmem:[%s202_s14 + $0x10] sm:$0xff] (%p45_p3) }
  0x18   : > { %v248_v2 = vld [vmem:[%s202_s14 + $0x20] sm:$0xff] (%p45_p3)  ;;  %245 = vst [vmem:[%s198_s15] sm:$0xff] (%p45_p3), %v244_v0  ;;  %247 = vst [vmem:[%s198_s15 + $0x8] sm:$0xff] (%p45_p3), %v246_v1  ;;  %v250_v3 = vld [vmem:[%s202_s14 + $0x30] sm:$0xff] (%p45_p3) }
  0x19   : > { %249 = vst [vmem:[%s198_s15 + $0x10] sm:$0xff] %v248_v2  ;;  %v252_v4 = vld [vmem:[%s202_s14 + $0x40] sm:$0xff]  ;;  %v254_v5 = vld [vmem:[%s202_s14 + $0x50] sm:$0xff]  ;;  %251 = vst [vmem:[%s198_s15 + $0x18] sm:$0xff] %v250_v3 }
  0x1a   : > { %253 = vst [vmem:[%s198_s15 + $0x20] sm:$0xff] %v252_v4  ;;  %255 = vst [vmem:[%s198_s15 + $0x28] sm:$0xff] %v254_v5  ;;  %v256_v6 = vld [vmem:[%s202_s14 + $0x60] sm:$0xff]  ;;  %v258_v7 = vld [vmem:[%s202_s14 + $0x70] sm:$0xff] }
  0x1b   : > { %257 = vst [vmem:[%s198_s15 + $0x30] sm:$0xff] %v256_v6  ;;  %259 = vst [vmem:[%s198_s15 + $0x38] sm:$0xff] %v258_v7 }
  0x1c PF: > { %p936_p7 = scmp.ge.s32.totalorder %s1176_s24, 1  ;;  %p264_p8 = scmp.lt.s32.totalorder %s1176_s24, 5 }
  0x1e   : > { %p265_p9 = pnand %p936_p7, %p264_p8 }
  0x1f   : > { %s271_s16 = sand.u32 (!%p265_p9), 1, %s1152_s18   ;;  %p298_p10 = scmp.lt.s32.totalorder (!%p265_p9), %s1164_s21, 1 }
  0x20   : > { %268 = sbr.rel (%p265_p9) target bundleno = 1061 (0x425), region = 74  ;;  %s937_s17 = sshll.u32 (!%p265_p9), %s271_s16, 6 }
  0x21   : > { %s273_s7 = scalar_lea.vmem (!%p265_p9), [#allocation3], %s937_s17  ;;  %p940_p11 = scmp.ne.s32.totalorder (!%p265_p9), %s1160_s20, 0 }
  0x27   : > { %s1503_s21 = smov (!%p298_p10, %s1164_s21), 1  ;;  %306 = sbr.rel (%p940_p11) target bundleno = 46 (0x2e), region = 82 }
  0x28   : > { %s956_s27 = sshll.u32 %s1503_s21, 6  ;;  %vm307_vm0 = vcmask (!%p940_p11), 15360   ;;  %v1178_v8 = vmov (!%p940_p11), 0.0  }
  0x29   : > { %s1279_s30 = scalar_lea.vmem %s1489_s5, %s956_s27  ;;  %308 = vst.msk [vmem:[#allocation2] sm:$0xff] (!%p940_p11), %vm307_vm0, %v1178_v8  ;;  %309 = vst.msk [vmem:[#allocation2 + $0x8] sm:$0xff] (!%p940_p11), %vm307_vm0, %v1178_v8 }
  0x2a   : > { %310 = vst.msk [vmem:[#allocation2 + $0x10] sm:$0xff] (!%p940_p11), %vm307_vm0, %v1178_v8  ;;  %311 = vst.msk [vmem:[#allocation2 + $0x18] sm:$0xff] (!%p940_p11), %vm307_vm0, %v1178_v8 }
  0x2b   : > { %312 = vst.msk [vmem:[#allocation2 + $0x20] sm:$0xff] (!%p940_p11), %vm307_vm0, %v1178_v8  ;;  %313 = vst.msk [vmem:[#allocation2 + $0x28] sm:$0xff] (!%p940_p11), %vm307_vm0, %v1178_v8 }
  0x2c   : > { %314 = vst.msk [vmem:[#allocation2 + $0x30] sm:$0xff] (!%p940_p11), %vm307_vm0, %v1178_v8  ;;  %315 = vst.msk [vmem:[#allocation2 + $0x38] sm:$0xff] (!%p940_p11), %vm307_vm0, %v1178_v8 }
  0x2e PF: > { %v318_v9 = vld [vmem:[%s273_s7 + $0x10] sm:$0xff]  ;;  %v316_v10 = vld [vmem:[%s273_s7] sm:$0xff]  ;;  %v319_v11 = vld [vmem:[%s273_s7 + $0x18] sm:$0xff]  ;;  %vm372_vm1 = vcmask 7168   ;;  %vm389_vm2 = vcmask 15360   ;;  %p941_p12 = scmp.ne.s32.totalorder %s1160_s20, 1 }
  0x2f   : > { %328 = vadd.xlane.f32.xlu1 %v318_v9  ;;  %324 = vadd.xlane.f32.xlu0 %v316_v10  ;;  %v317_v12 = vld [vmem:[%s273_s7 + $0x8] sm:$0xff]  ;;  %v320_v14 = vld [vmem:[%s273_s7 + $0x20] sm:$0xff]  ;;  %v323_v15 = vld [vmem:[%s273_s7 + $0x38] sm:$0xff]  ;;  %v340_v18 = vmul.f32 %v316_v10, %v316_v10  ;;  %v343_v19 = vmul.f32 %v319_v11, %v319_v11  ;;  %v342_v20 = vmul.f32 %v318_v9, %v318_v9  ;;  %vm414_vm3 = vcmask (!%p941_p12), 523264   ;;  %s1179_s13 = smov (!%p941_p12), 1   ;;  %s1180_s14 = smov (!%p941_p12), 127  }
  0x30   : > { %v321_v13 = vld [vmem:[%s273_s7 + $0x28] sm:$0xff]  ;;  %v322_v16 = vld [vmem:[%s273_s7 + $0x30] sm:$0xff]  ;;  %v341_v17 = vmul.f32 %v317_v12, %v317_v12  ;;  %v344_v22 = vmul.f32 %v320_v14, %v320_v14  ;;  %v347_v23 = vmul.f32 %v323_v15, %v323_v15  ;;  %v364_v34 = vld [vmem:[#allocation2] sm:$0xff]  ;;  %vm557_vm4 = vcmask (!%p941_p12), 261120  }
  0x31   : > { %v345_v21 = vmul.f32 %v321_v13, %v321_v13  ;;  %v346_v24 = vmul.f32 %v322_v16, %v322_v16  ;;  %v365_v33 = vld [vmem:[#allocation2 + $0x8] sm:$0xff]  ;;  %v367_v41 = vld [vmem:[#allocation2 + $0x18] sm:$0xff]  ;;  %v366_v42 = vld [vmem:[#allocation2 + $0x10] sm:$0xff] }
  0x32   : > { %v369_v49 = vld [vmem:[#allocation2 + $0x28] sm:$0xff]  ;;  %v368_v50 = vld [vmem:[#allocation2 + $0x20] sm:$0xff] }
  0x33   : > { %330 = vadd.xlane.f32.xlu1 %v319_v11  ;;  %326 = vadd.xlane.f32.xlu0 %v317_v12  ;;  %v371_v57 = vld [vmem:[#allocation2 + $0x38] sm:$0xff]  ;;  %v370_v58 = vld [vmem:[#allocation2 + $0x30] sm:$0xff]  ;;  %v402_v9 = vld [vmem:[%s1487_s3] sm:$0xff] (!%p941_p12) }
  0x34   : > { %997 = vmatprep.mubr.msk.f32.mxu0 (!%p941_p12), %vm414_vm3, %v402_v9 }
  0x37   : > { %334 = vadd.xlane.f32.xlu1 %v321_v13  ;;  %332 = vadd.xlane.f32.xlu0 %v320_v14  ;;  %v403_v14 = vld [vmem:[%s1487_s3 + $0x8] sm:$0xff] (!%p941_p12) }
  0x3b   : > { %338 = vadd.xlane.f32.xlu1 %v323_v15  ;;  %336 = vadd.xlane.f32.xlu0 %v322_v16  ;;  %v404_v15 = vld [vmem:[%s1487_s3 + $0x10] sm:$0xff] (!%p941_p12)  ;;  %v405_v16 = vld [vmem:[%s1487_s3 + $0x18] sm:$0xff] (!%p941_p12) }
  0x3f   : > { %350 = vadd.xlane.f32.xlu1 %v341_v17  ;;  %348 = vadd.xlane.f32.xlu0 %v340_v18 }
  0x43   : > { %354 = vadd.xlane.f32.xlu1 %v343_v19  ;;  %352 = vadd.xlane.f32.xlu0 %v342_v20 }
  0x47   : > { %358 = vadd.xlane.f32.xlu1 %v345_v21  ;;  %356 = vadd.xlane.f32.xlu0 %v344_v22 }
  0x4b   : > { %362 = vadd.xlane.f32.xlu1 %v347_v23  ;;  %360 = vadd.xlane.f32.xlu0 %v346_v24 }
  0xbc   : > { %v329_v25 = vpop.xlane.xlu1 %328  ;;  %v325_v26 = vpop.xlane.xlu0 %324 }
  0xc0   : > { %v331_v27 = vpop.xlane.xlu1 %330  ;;  %v327_v28 = vpop.xlane.xlu0 %326 }
  0xc4   : > { %v335_v29 = vpop.xlane.xlu1 %334  ;;  %v333_v30 = vpop.xlane.xlu0 %332 }
  0xc8   : > { %v339_v31 = vpop.xlane.xlu1 %338  ;;  %v337_v32 = vpop.xlane.xlu0 %336 }
  0xcc   : > { %v351_v35 = vpop.xlane.xlu1 %350  ;;  %v349_v36 = vpop.xlane.xlu0 %348 }
  0xcd   : > { %v374_v37 = vsel %vm372_vm1, %v327_v28, %v351_v35  ;;  %v373_v38 = vsel %vm372_vm1, %v325_v26, %v349_v36  ;;  %v545_v28 = vld [vmem:[%s1488_s4] sm:$0xff] (!%p941_p12)  ;;  %v710_v36 = vld [vmem:[%s1485_s1 + $0x38] sm:$0xff] (!%p941_p12) }
  0xce   : > { %v382_v39 = vadd.f32 %v374_v37, %v365_v33  ;;  %v381_v40 = vadd.f32 %v373_v38, %v364_v34  ;;  %1011 = vmatprep.mubr.msk.f32.mxu1 (!%p941_p12), %vm557_vm4, %v545_v28  ;;  %v705_v33 = vld [vmem:[%s1485_s1 + $0x10] sm:$0xff] (!%p941_p12)  ;;  %v708_v34 = vld [vmem:[%s1485_s1 + $0x28] sm:$0xff] (!%p941_p12)  ;;  %v707_v35 = vld [vmem:[%s1485_s1 + $0x20] sm:$0xff] (!%p941_p12) }
  0xcf   : > { %v709_v37 = vld [vmem:[%s1485_s1 + $0x30] sm:$0xff] (!%p941_p12) }
  0xd0   : > { %391 = vst.msk [vmem:[#allocation2 + $0x8] sm:$0xff] %vm389_vm2, %v382_v39  ;;  %390 = vst.msk [vmem:[#allocation2] sm:$0xff] %vm389_vm2, %v381_v40  ;;  %v355_v43 = vpop.xlane.xlu1 %354  ;;  %v353_v44 = vpop.xlane.xlu0 %352 }
  0xd1   : > { %v376_v45 = vsel %vm372_vm1, %v331_v27, %v355_v43  ;;  %v375_v46 = vsel %vm372_vm1, %v329_v25, %v353_v44 }
  0xd2   : > { %v384_v47 = vadd.f32 %v376_v45, %v367_v41  ;;  %v383_v48 = vadd.f32 %v375_v46, %v366_v42 }
  0xd4   : > { %393 = vst.msk [vmem:[#allocation2 + $0x18] sm:$0xff] %vm389_vm2, %v384_v47  ;;  %392 = vst.msk [vmem:[#allocation2 + $0x10] sm:$0xff] %vm389_vm2, %v383_v48  ;;  %v359_v51 = vpop.xlane.xlu1 %358  ;;  %v357_v52 = vpop.xlane.xlu0 %356 }
  0xd5   : > { %v378_v53 = vsel %vm372_vm1, %v335_v29, %v359_v51  ;;  %v377_v54 = vsel %vm372_vm1, %v333_v30, %v357_v52  ;;  %v704_v30 = vld [vmem:[%s1485_s1 + $0x8] sm:$0xff] (!%p941_p12) }
  0xd6   : > { %v386_v55 = vadd.f32 %v378_v53, %v369_v49  ;;  %v385_v56 = vadd.f32 %v377_v54, %v368_v50  ;;  %401 = sbr.rel (%p941_p12) target bundleno = 1061 (0x425), region = 86 }
  0xd7   : > { %v406_v1 = vld [vmem:[#allocation2] sm:$0xff] (!%p941_p12)  ;;  %v407_v2 = vld [vmem:[#allocation2 + $0x8] sm:$0xff] (!%p941_p12) }
  0xd8   : > { %395 = vst.msk [vmem:[#allocation2 + $0x28] sm:$0xff] %vm389_vm2, %v386_v55  ;;  %394 = vst.msk [vmem:[#allocation2 + $0x20] sm:$0xff] %vm389_vm2, %v385_v56  ;;  %v363_v59 = vpop.xlane.xlu1 %362  ;;  %v361_v60 = vpop.xlane.xlu0 %360  ;;  %v1023_v4 = vpack.c.bf16 (!%p941_p12), %v407_v2, %v406_v1  ;;  %v546_v56 = vld [vmem:[%s1488_s4 + $0x8] sm:$0xff] (!%p941_p12) }
  0xd9   : > { %v380_v61 = vsel %vm372_vm1, %v339_v31, %v363_v59  ;;  %v379_v62 = vsel %vm372_vm1, %v337_v32, %v361_v60  ;;  %v703_v31 = vld [vmem:[%s1485_s1] sm:$0xff] (!%p941_p12)  ;;  %v706_v32 = vld [vmem:[%s1485_s1 + $0x18] sm:$0xff] (!%p941_p12)  ;;  %v550_v60 = vld [vmem:[%s1488_s4 + $0x28] sm:$0xff] (!%p941_p12) }
  0xda   : > { %v388_v63 = vadd.f32 %v380_v61, %v371_v57  ;;  %v387_v0 = vadd.f32 %v379_v62, %v370_v58  ;;  %1024 = vmatprep.subr.bf16.mxu0 (!%p941_p12), %v1023_v4  ;;  %v547_v57 = vld [vmem:[%s1488_s4 + $0x10] sm:$0xff] (!%p941_p12)  ;;  %v548_v58 = vld [vmem:[%s1488_s4 + $0x18] sm:$0xff] (!%p941_p12)  ;;  %v549_v59 = vld [vmem:[%s1488_s4 + $0x20] sm:$0xff] (!%p941_p12) }
  0xdb   : > { %v408_v3 = vld [vmem:[#allocation2 + $0x10] sm:$0xff] (!%p941_p12)  ;;  %v409_v5 = vld [vmem:[#allocation2 + $0x18] sm:$0xff] (!%p941_p12)  ;;  %1026 = vmatpush3.bf16.msra.mxu0 (!%p941_p12), %v1023_v4 }
  0xdc   : > { %397 = vst.msk [vmem:[#allocation2 + $0x38] sm:$0xff] %vm389_vm2, %v388_v63  ;;  %396 = vst.msk [vmem:[#allocation2 + $0x30] sm:$0xff] %vm389_vm2, %v387_v0  ;;  %v1027_v6 = vpack.c.bf16 (!%p941_p12), %v409_v5, %v408_v3  ;;  %v551_v61 = vld [vmem:[%s1488_s4 + $0x30] sm:$0xff] (!%p941_p12)  ;;  %v552_v62 = vld [vmem:[%s1488_s4 + $0x38] sm:$0xff] (!%p941_p12) }
  0xde   : > { %1028 = vmatprep.subr.bf16.mxu0 %v1027_v6 }
  0xdf   : > { %v410_v7 = vld [vmem:[#allocation2 + $0x20] sm:$0xff]  ;;  %v411_v8 = vld [vmem:[#allocation2 + $0x28] sm:$0xff]  ;;  %1030 = vmatpush3.bf16.msra.mxu0 %v1027_v6 }
  0xe0   : > { %v1031_v10 = vpack.c.bf16 %v411_v8, %v410_v7 }
  0xe2   : > { %1032 = vmatprep.subr.bf16.mxu0 %v1031_v10 }
  0xe3   : > { %v412_v11 = vld [vmem:[#allocation2 + $0x30] sm:$0xff]  ;;  %v413_v12 = vld [vmem:[#allocation2 + $0x38] sm:$0xff]  ;;  %1034 = vmatpush3.bf16.msra.mxu0 %v1031_v10 }
  0xe4   : > { %v1035_v13 = vpack.c.bf16 %v413_v12, %v412_v11 }
  0xe6   : > { %1036 = vmatprep.subr.bf16.mxu0 %v1035_v13 }
  0xe7   : > { %1038 = vmatpush3.bf16.msra.mxu0 %v1035_v13 }
  0xea   : > { %998 = vmatmul.mubr.msk.f32.vlgmr.msra.gmra.mrb[0].mxu0 %vm414_vm3, %v403_v14 }
  0xeb   : > { %1000 = vmatprep.mubr.msk.f32.mxu0 %vm414_vm3, %v404_v15 }
  0xee   : > { %1001 = vmatmul.mubr.msk.f32.gmra.mrb[2].mxu0 %vm414_vm3, %v405_v16 }
 0x1bd   : > { %v999_v17 = vpop.f32.mrb[0].mxu0 }
 0x1be   : > { %v493_v18 = vpop.f32.mrb[1].mxu0  ;;  %v514_v20 = vmul.f32 0.001953125, %v999_v17 }
 0x1bf   : > { %v513_v19 = vmul.f32 0.001953125, %v493_v18 }
 0x1c0   : > { %v518_v26 = vmul.f32 %v514_v20, %v514_v20 }
 0x1c1   : > { %v1002_v21 = vpop.f32.mrb[2].mxu0  ;;  %v517_v22 = vmul.f32 %v513_v19, %v513_v19 }
 0x1c2   : > { %v503_v23 = vpop.f32.mrb[3].mxu0  ;;  %v516_v25 = vmul.f32 0.001953125, %v1002_v21 }
 0x1c3   : > { %v515_v24 = vmul.f32 0.001953125, %v503_v23  ;;  %525 = vrot.lane.b32.xlu0 %v517_v22, %s1179_s13 }
 0x1c4   : > { %v520_v29 = vmul.f32 %v516_v25, %v516_v25 }
 0x1c5   : > { %v519_v27 = vmul.f32 %v515_v24, %v515_v24 }
 0x1c7   : > { %527 = vrot.lane.b32.xlu0 %v518_v26, %s1179_s13  ;;  %529 = vrot.lane.b32.xlu1 %v519_v27, %s1179_s13 }
 0x1cb   : > { %531 = vrot.lane.b32.xlu1 %v520_v29, %s1179_s13  ;;  %719 = vrot.lane.b32.xlu0 %v703_v31, %s1179_s13 }
 0x1cf   : > { %721 = vrot.lane.b32.xlu1 %v704_v30, %s1179_s13  ;;  %723 = vrot.lane.b32.xlu0 %v705_v33, %s1179_s13 }
 0x1d3   : > { %725 = vrot.lane.b32.xlu1 %v706_v32, %s1179_s13  ;;  %727 = vrot.lane.b32.xlu0 %v707_v35, %s1179_s13 }
 0x1d7   : > { %729 = vrot.lane.b32.xlu1 %v708_v34, %s1179_s13  ;;  %731 = vrot.lane.b32.xlu0 %v709_v37, %s1179_s13 }
 0x1db   : > { %733 = vrot.lane.b32.xlu1 %v710_v36, %s1179_s13 }
 0x235   : > { %v526_v38 = vpop.permute.xlu0 %525 }
 0x236   : > { %v537_v39 = vsub.f32 %v513_v19, %v526_v38 }
 0x238   : > { %v541_v42 = vmax.f32 %v537_v39, 0.0  ;;  %v752_v39 = vld [vmem:[%s1486_s2 + $0x8] sm:$0xff] }
 0x239   : > { %v528_v40 = vpop.permute.xlu0 %527  ;;  %v530_v41 = vpop.permute.xlu1 %529 }
 0x23a   : > { %v538_v43 = vsub.f32 %v514_v20, %v528_v40  ;;  %v539_v44 = vsub.f32 %v515_v24, %v530_v41  ;;  %v553_v49 = vsel %vm372_vm1, %v513_v19, %v541_v42  ;;  %v751_v42 = vld [vmem:[%s1486_s2] sm:$0xff] }
 0x23c   : > { %v542_v45 = vmax.f32 %v538_v43, 0.0  ;;  %v543_v47 = vmax.f32 %v539_v44, 0.0 }
 0x23d   : > { %v532_v46 = vpop.permute.xlu1 %531  ;;  %v720_v8 = vpop.permute.xlu0 %719 }
 0x23e   : > { %v540_v48 = vsub.f32 %v516_v25, %v532_v46  ;;  %v554_v50 = vsel %vm372_vm1, %v514_v20, %v542_v45  ;;  %v555_v53 = vsel %vm372_vm1, %v515_v24, %v543_v47  ;;  %v754_v47 = vld [vmem:[%s1486_s2 + $0x18] sm:$0xff] }
 0x23f   : > { %v1039_v51 = vpack.c.bf16 %v554_v50, %v553_v49  ;;  %v753_v50 = vld [vmem:[%s1486_s2 + $0x10] sm:$0xff] }
 0x240   : > { %v544_v52 = vmax.f32 %v540_v48, 0.0 }
 0x241   : > { %1040 = vmatprep.subr.bf16.mxu1 %v1039_v51  ;;  %v722_v6 = vpop.permute.xlu1 %721  ;;  %v724_v15 = vpop.permute.xlu0 %723 }
 0x242   : > { %v556_v54 = vsel %vm372_vm1, %v516_v25, %v544_v52  ;;  %1042 = vmatpush3.bf16.msra.mxu1 %v1039_v51 }
 0x243   : > { %v1043_v55 = vpack.c.bf16 %v556_v54, %v555_v53 }
 0x245   : > { %1044 = vmatprep.subr.bf16.mxu1 %v1043_v55  ;;  %v726_v13 = vpop.permute.xlu1 %725  ;;  %v728_v27 = vpop.permute.xlu0 %727 }
 0x246   : > { %1046 = vmatpush3.bf16.msra.mxu1 %v1043_v55  ;;  %v756_v55 = vld [vmem:[%s1486_s2 + $0x28] sm:$0xff] }
 0x249   : > { %1012 = vmatmul.mubr.msk.f32.vlgmr.msra.gmra.mrb[0].mxu1 %vm557_vm4, %v546_v56  ;;  %v730_v24 = vpop.permute.xlu1 %729  ;;  %v732_v34 = vpop.permute.xlu0 %731 }
 0x24a   : > { %1014 = vmatprep.mubr.msk.f32.mxu1 %vm557_vm4, %v547_v57 }
 0x24d   : > { %1015 = vmatmul.mubr.msk.f32.gmra.mrb[2].mxu1 %vm557_vm4, %v548_v58  ;;  %v734_v33 = vpop.permute.xlu1 %733  ;;  %v755_v58 = vld [vmem:[%s1486_s2 + $0x20] sm:$0xff] }
 0x24e   : > { %1017 = vmatprep.mubr.msk.f32.mxu1 %vm557_vm4, %v549_v59 }
 0x251   : > { %1018 = vmatmul.mubr.msk.f32.gmra.mrb[4].mxu1 %vm557_vm4, %v550_v60 }
 0x252   : > { %1020 = vmatprep.mubr.msk.f32.mxu1 %vm557_vm4, %v551_v61 }
 0x255   : > { %1021 = vmatmul.mubr.msk.f32.gmra.mrb[6].mxu1 %vm557_vm4, %v552_v62 }
 0x31c   : > { %v1013_v63 = vpop.f32.mrb[0].mxu1 }
 0x31d   : > { %v688_v0 = vadd.f32 1e-05, %v1013_v63  ;;  %v648_v1 = vpop.f32.mrb[1].mxu1 }
 0x31e   : > { %v687_v2 = vadd.f32 1e-05, %v648_v1 }
 0x31f   : > { %1106 = vrsqrt.f32 %v688_v0 }
 0x320   : > { %1108 = vrsqrt.f32 %v687_v2  ;;  %v1016_v3 = vpop.f32.mrb[2].mxu1  ;;  %v757_v2 = vld [vmem:[%s1486_s2 + $0x30] sm:$0xff] }
 0x321   : > { %v690_v4 = vadd.f32 1e-05, %v1016_v3  ;;  %v1387_v5 = vpop.f32.mrb[3].mxu1 }
 0x322   : > { %v689_v7 = vadd.f32 1e-05, %v1387_v5 }
 0x323   : > { %1110 = vrsqrt.f32 %v690_v4 }
 0x324   : > { %1112 = vrsqrt.f32 %v689_v7  ;;  %v1390_v9 = vpop.f32.mrb[4].mxu1 }
 0x325   : > { %v692_v10 = vadd.f32 1e-05, %v1390_v9  ;;  %v1393_v11 = vpop.f32.mrb[5].mxu1 }
 0x326   : > { %v691_v12 = vadd.f32 1e-05, %v1393_v11 }
 0x327   : > { %1114 = vrsqrt.f32 %v692_v10 }
 0x328   : > { %1116 = vrsqrt.f32 %v691_v12  ;;  %v1396_v14 = vpop.f32.mrb[6].mxu1 }
 0x329   : > { %v1107_v16 = vpop.eup %1106  ;;  %v694_v17 = vadd.f32 1e-05, %v1396_v14  ;;  %v1399_v18 = vpop.f32.mrb[7].mxu1 }
 0x32a   : > { %v1109_v19 = vpop.eup %1108  ;;  %v693_v20 = vadd.f32 1e-05, %v1399_v18  ;;  %v744_v21 = vmul.f32 %v1107_v16, %v722_v6 }
 0x32b   : > { %1118 = vrsqrt.f32 %v694_v17  ;;  %v743_v22 = vmul.f32 %v1109_v19, %v720_v8 }
 0x32c   : > { %1120 = vrsqrt.f32 %v693_v20  ;;  %769 = vrot.lane.b32.xlu1 %v744_v21, %s1180_s14 }
 0x32d   : > { %v1111_v23 = vpop.eup %1110  ;;  %767 = vrot.lane.b32.xlu0 %v743_v22, %s1180_s14 }
 0x32e   : > { %v1113_v25 = vpop.eup %1112  ;;  %v746_v26 = vmul.f32 %v1111_v23, %v726_v13 }
 0x32f   : > { %v745_v28 = vmul.f32 %v1113_v25, %v724_v15 }
 0x330   : > { %773 = vrot.lane.b32.xlu1 %v746_v26, %s1180_s14 }
 0x331   : > { %v1115_v29 = vpop.eup %1114  ;;  %771 = vrot.lane.b32.xlu0 %v745_v28, %s1180_s14 }
 0x332   : > { %v1117_v30 = vpop.eup %1116  ;;  %v748_v31 = vmul.f32 %v1115_v29, %v730_v24 }
 0x333   : > { %v747_v32 = vmul.f32 %v1117_v30, %v728_v27 }
 0x334   : > { %777 = vrot.lane.b32.xlu1 %v748_v31, %s1180_s14 }
 0x335   : > { %v1119_v35 = vpop.eup %1118  ;;  %775 = vrot.lane.b32.xlu0 %v747_v32, %s1180_s14 }
 0x336   : > { %v1121_v36 = vpop.eup %1120  ;;  %v750_v37 = vmul.f32 %v1119_v35, %v734_v33 }
 0x337   : > { %v749_v38 = vmul.f32 %v1121_v36, %v732_v34 }
 0x338   : > { %781 = vrot.lane.b32.xlu1 %v750_v37, %s1180_s14 }
 0x339   : > { %779 = vrot.lane.b32.xlu0 %v749_v38, %s1180_s14 }
 0x39e   : > { %v770_v40 = vpop.permute.xlu1 %769 }
 0x39f   : > { %v792_v41 = vmul.f32 %v1013_v63, %v770_v40  ;;  %v768_v43 = vpop.permute.xlu0 %767  ;;  %v758_v63 = vld [vmem:[%s1486_s2 + $0x38] sm:$0xff] }
 0x3a0   : > { %v791_v44 = vmul.f32 %v768_v43, %v648_v1 }
 0x3a1   : > { %v800_v45 = vsub.f32 %v752_v39, %v792_v41 }
 0x3a2   : > { %v799_v46 = vsub.f32 %v751_v42, %v791_v44  ;;  %v774_v48 = vpop.permute.xlu1 %773 }
 0x3a3   : > { %v794_v49 = vmul.f32 %v1016_v3, %v774_v48  ;;  %v772_v51 = vpop.permute.xlu0 %771  ;;  %817 = vrot.lane.b32.xlu1 %v800_v45, %s1179_s13 }
 0x3a4   : > { %v793_v52 = vmul.f32 %v772_v51, %v1387_v5  ;;  %815 = vrot.lane.b32.xlu0 %v799_v46, %s1179_s13 }
 0x3a5   : > { %v802_v53 = vsub.f32 %v754_v47, %v794_v49 }
 0x3a6   : > { %v801_v54 = vsub.f32 %v753_v50, %v793_v52  ;;  %v778_v56 = vpop.permute.xlu1 %777 }
 0x3a7   : > { %v796_v57 = vmul.f32 %v1390_v9, %v778_v56  ;;  %v776_v59 = vpop.permute.xlu0 %775  ;;  %821 = vrot.lane.b32.xlu1 %v802_v53, %s1179_s13 }
 0x3a8   : > { %v795_v60 = vmul.f32 %v776_v59, %v1393_v11  ;;  %819 = vrot.lane.b32.xlu0 %v801_v54, %s1179_s13 }
 0x3a9   : > { %v804_v61 = vsub.f32 %v756_v55, %v796_v57 }
 0x3aa   : > { %v803_v62 = vsub.f32 %v755_v58, %v795_v60  ;;  %v782_v0 = vpop.permute.xlu1 %781 }
 0x3ab   : > { %v798_v1 = vmul.f32 %v1396_v14, %v782_v0  ;;  %v780_v3 = vpop.permute.xlu0 %779  ;;  %825 = vrot.lane.b32.xlu1 %v804_v61, %s1179_s13 }
 0x3ac   : > { %v797_v4 = vmul.f32 %v780_v3, %v1399_v18  ;;  %823 = vrot.lane.b32.xlu0 %v803_v62, %s1179_s13 }
 0x3ad   : > { %v806_v5 = vsub.f32 %v758_v63, %v798_v1 }
 0x3ae   : > { %v805_v6 = vsub.f32 %v757_v2, %v797_v4 }
 0x3af   : > { %829 = vrot.lane.b32.xlu1 %v806_v5, %s1179_s13 }
 0x3b0   : > { %827 = vrot.lane.b32.xlu0 %v805_v6, %s1179_s13 }
 0x415   : > { %v818_v7 = vpop.permute.xlu1 %817 }
 0x416   : > { %v840_v8 = vsel %vm372_vm1, %v770_v40, %v818_v7  ;;  %v816_v9 = vpop.permute.xlu0 %815 }
 0x417   : > { %848 = vst.msk [vmem:[%s1279_s30 + $0x8] sm:$0xff] %vm389_vm2, %v840_v8  ;;  %v839_v10 = vsel %vm372_vm1, %v768_v43, %v816_v9 }
 0x418   : > { %847 = vst.msk [vmem:[%s1279_s30] sm:$0xff] %vm389_vm2, %v839_v10 }
 0x419   : > { %v822_v11 = vpop.permute.xlu1 %821 }
 0x41a   : > { %v842_v12 = vsel %vm372_vm1, %v774_v48, %v822_v11  ;;  %v820_v13 = vpop.permute.xlu0 %819 }
 0x41b   : > { %850 = vst.msk [vmem:[%s1279_s30 + $0x18] sm:$0xff] %vm389_vm2, %v842_v12  ;;  %v841_v14 = vsel %vm372_vm1, %v772_v51, %v820_v13 }
 0x41c   : > { %849 = vst.msk [vmem:[%s1279_s30 + $0x10] sm:$0xff] %vm389_vm2, %v841_v14 }
 0x41d   : > { %v826_v15 = vpop.permute.xlu1 %825 }
 0x41e   : > { %v844_v16 = vsel %vm372_vm1, %v778_v56, %v826_v15  ;;  %v824_v17 = vpop.permute.xlu0 %823 }
 0x41f   : > { %852 = vst.msk [vmem:[%s1279_s30 + $0x28] sm:$0xff] %vm389_vm2, %v844_v16  ;;  %v843_v18 = vsel %vm372_vm1, %v776_v59, %v824_v17 }
 0x420   : > { %851 = vst.msk [vmem:[%s1279_s30 + $0x20] sm:$0xff] %vm389_vm2, %v843_v18 }
 0x421   : > { %v830_v19 = vpop.permute.xlu1 %829 }
 0x422   : > { %v846_v20 = vsel %vm372_vm1, %v782_v0, %v830_v19  ;;  %v828_v21 = vpop.permute.xlu0 %827 }
 0x423   : > { %854 = vst.msk [vmem:[%s1279_s30 + $0x38] sm:$0xff] %vm389_vm2, %v846_v20  ;;  %v845_v22 = vsel %vm372_vm1, %v780_v3, %v828_v21 }
 0x424   : > { %853 = vst.msk [vmem:[%s1279_s30 + $0x30] sm:$0xff] %vm389_vm2, %v845_v22 }
 0x425 PF: > { %s15_s24 = sadd.s32 1, %s1176_s24   ;;  %s1490_s18 = smov %s1156_s19 }
 0x426   : > { %p12_p13 = scmp.ge.s32.totalorder %s15_s24, 6   ;;  %s1491_s19 = smov %s1262_s6 }
 0x427   : > { %s1492_s20 = smov %s1168_s22  ;;  %s1493_s21 = smov %s1172_s23 }
 0x428   : > { %s1494_s22 = smov %s1497_s25  ;;  %s1495_s23 = smov %s1501_s26 }
 0x429   :  { %14 = sbr.rel (!%p12_p13) target bundleno = 4 (0x4), region = 121 }

// kernel: unet_output_layer.3
= control target key start
LH: loop header
LB: loop body
LE: loop exit
PB: predicated region body
PF: predicated region fallthrough
CT: control target
= control target key end

     0   :  { %s1883_s21 = smov 0   ;;  %s1885_s22 = smov 0   ;;  %s2396_s0 = inlined_call_operand.vmem [shape: f32[2,64,256], index: 0, kind: input, shape index: {}]   ;;  %s2397_s1 = inlined_call_operand.vmem [shape: f32[2,2,64,16], index: 1, kind: input, shape index: {}]   ;;  %s2398_s2 = inlined_call_operand.vmem [shape: f32[2,2,64,16], index: 2, kind: input, shape index: {}]   ;;  %s2399_s3 = inlined_call_operand.vmem [shape: f32[2,64,2], index: 3, kind: input, shape index: {}]   ;;  %s2400_s4 = inlined_call_operand.vmem [shape: bf16[72,64], index: 4, kind: input, shape index: {}]   ;;  %s2401_s5 = inlined_call_operand.vmem [shape: f32[8,1], index: 5, kind: input, shape index: {}]   ;;  %s2402_s6 = inlined_call_operand.vmem [shape: f32[2,4,256], index: 6, kind: output, shape index: {}]  }
   0x1   :  { %s1887_s23 = smov 0   ;;  %s1889_s24 = smov 0  }
   0x2   :  { %s1891_s25 = smov 0   ;;  %s1893_s26 = smov 0  }
   0x3   :  { %s1895_s27 = smov 0  }
   0x4 LB: > { %s25_s28 = sadd.s32 1, %s1811_s25  ;;  %s28_s29 = sadd.s32 1, %s1815_s26  ;;  %s1819_s27 = sphi %s1895_s27, %s16_s27   ;;  %s1815_s26 = sphi %s1893_s26, %s2421_s26   ;;  %s1811_s25 = sphi %s1891_s25, %s2420_s25   ;;  %s1807_s24 = sphi %s1889_s24, %s2419_s24   ;;  %s1803_s23 = sphi %s1887_s23, %s2418_s23   ;;  %s1799_s22 = sphi %s1885_s22, %s2417_s22   ;;  %s1795_s21 = sphi %s1883_s21, %s2416_s21  }
   0x5   : > { %p26_p0 = scmp.ge.s32.totalorder %s25_s28, 2  ;;  %p44_p1 = scmp.ne.s32.totalorder %s1799_s22, %s1795_s21 }
   0x6   : > { %p45_p2 = scmp.eq.s32.totalorder %s1819_s27, 0  ;;  %s37_s9 = sadd.s32 1, %s1799_s22 }
   0x7   : > { %s2423_s28 = smov (%p26_p0, %s25_s28), 0  ;;  %s2425_s29 = smov (!%p26_p0, %s28_s29), %s1815_s26 }
   0x8   : > { %p46_p3 = por %p45_p2, %p44_p1  ;;  %p30_p4 = scmp.ge.s32.totalorder %s2425_s29, 2 }
   0x9   : > { %s33_s30 = ssub.s32 %s1811_s25, %s2423_s28  ;;  %p1437_p6 = scmp.ge.s32.totalorder %s1819_s27, 4 }
   0xa   : > { %s2427_s29 = smov (%p30_p4, %s2425_s29), 0 }
   0xb   : > { %s32_s7 = ssub.s32 %s1815_s26, %s2427_s29  ;;  %240 = sbr.rel (%p1437_p6) target bundleno = 28 (0x1c), region = 24 }
   0xc   : > { %s34_s8 = sor.u32 %s33_s30, %s32_s7 }
   0xd   : > { %p35_p5 = scmp.eq.s32.totalorder %s34_s8, 0 }
   0xf   : > { %s1934_s10 = scalar_select %p35_p5, %s1799_s22, %s37_s9  }
  0x12   : > { %243 = sbr.rel (!%p46_p3) target bundleno = 28 (0x1c), region = 28  ;;  %s245_s11 = sand.u32 (%p46_p3), 1, %s1799_s22  }
  0x13   : > { %s1439_s12 = sshll.u32 (%p46_p3), %s1815_s26, 4  ;;  %s1438_s13 = sshll.u32 (%p46_p3), %s245_s11, 6 }
  0x14   : > { %s249_s14 = sadd.s32 (%p46_p3), %s1811_s25, %s1439_s12  ;;  %s247_s19 = scalar_lea.vmem (%p46_p3), [#allocation2], %s1438_s13 }
  0x15   : > { %s1440_s15 = sshll.u32 (%p46_p3), %s249_s14, 3 }
  0x16   : > { %s251_s18 = scalar_lea.vmem (%p46_p3), %s2396_s0, %s1440_s15 }
  0x17   : > { %v293_v0 = vld [vmem:[%s251_s18] sm:$0xff] (%p46_p3)  ;;  %v295_v1 = vld [vmem:[%s251_s18 + $0x10] sm:$0xff] (%p46_p3) }
  0x18   : > { %v297_v2 = vld [vmem:[%s251_s18 + $0x20] sm:$0xff] (%p46_p3)  ;;  %294 = vst [vmem:[%s247_s19] sm:$0xff] (%p46_p3), %v293_v0  ;;  %296 = vst [vmem:[%s247_s19 + $0x8] sm:$0xff] (%p46_p3), %v295_v1  ;;  %v299_v3 = vld [vmem:[%s251_s18 + $0x30] sm:$0xff] (%p46_p3) }
  0x19   : > { %298 = vst [vmem:[%s247_s19 + $0x10] sm:$0xff] %v297_v2  ;;  %v301_v4 = vld [vmem:[%s251_s18 + $0x40] sm:$0xff]  ;;  %v303_v5 = vld [vmem:[%s251_s18 + $0x50] sm:$0xff]  ;;  %300 = vst [vmem:[%s247_s19 + $0x18] sm:$0xff] %v299_v3 }
  0x1a   : > { %302 = vst [vmem:[%s247_s19 + $0x20] sm:$0xff] %v301_v4  ;;  %304 = vst [vmem:[%s247_s19 + $0x28] sm:$0xff] %v303_v5  ;;  %v305_v6 = vld [vmem:[%s251_s18 + $0x60] sm:$0xff]  ;;  %v307_v7 = vld [vmem:[%s251_s18 + $0x70] sm:$0xff] }
  0x1b   : > { %306 = vst [vmem:[%s247_s19 + $0x30] sm:$0xff] %v305_v6  ;;  %308 = vst [vmem:[%s247_s19 + $0x38] sm:$0xff] %v307_v7 }
  0x1c PF: > { %p1441_p7 = scmp.ge.s32.totalorder %s1819_s27, 1  ;;  %p357_p8 = scmp.lt.s32.totalorder %s1819_s27, 5 }
  0x1e   : > { %p358_p9 = pnand %p1441_p7, %p357_p8 }
  0x1f   : > { %p428_p10 = scmp.lt.s32.totalorder (!%p358_p9), %s1807_s24, 1  ;;  %v1821_v8 = vmov (!%p358_p9), 1   ;;  %v1822_v12 = vmov (!%p358_p9), 0   ;;  %v1823_v18 = vmov (!%p358_p9), 0.0   ;;  %vm1824_vm0 = vmmov (!%p358_p9), 0   ;;  %s1443_s9 = sadd.s32 (!%p358_p9), 4294967295, %s1803_s23 }
  0x20   : > { %361 = sbr.rel (%p358_p9) target bundleno = 920 (0x398), region = 78  ;;  %1703 = vset.pattern.permute.xlu0 (!%p358_p9), %v1821_v8  ;;  %1701 = vset.pattern.permute.xlu1 (!%p358_p9), %v1821_v8  ;;  %s440_s11 = sadd.s32 (!%p358_p9), 1, %s1803_s23  ;;  %vm762_vm1 = vcmask (!%p358_p9), 523264   ;;  %vm1004_vm2 = vcmask (!%p358_p9), 1047680   ;;  %vm1036_vm3 = vcmask (!%p358_p9), 130048   ;;  %vm1038_vm4 = vcmask (!%p358_p9), 261120  }
  0x21   : > { %1526 = vmatprep.subr.bf16.mxu0 (!%p358_p9), %v1823_v18  ;;  %1610 = vmatprep.subr.bf16.mxu1 (!%p358_p9), %v1823_v18  ;;  %p426_p11 = scmp.gt.s32.totalorder (!%p358_p9), %s1443_s9, 0  ;;  %p1961_p12 = scmp.lt.s32.totalorder (!%p358_p9), %s440_s11, 1  ;;  %vm1040_vm5 = vcmask (!%p358_p9), 392192   ;;  %vm1043_vm6 = vcmask (!%p358_p9), 654336   ;;  %vm1045_vm7 = vcmask (!%p358_p9), 785408   ;;  %vm1047_vm8 = vcmask (!%p358_p9), 916480  }
  0x22   : > { %1534 = vmatprep.mubr.msk.bf16.mxu0 (!%p358_p9), %vm1824_vm0, %v1823_v18  ;;  %1542 = vmatprep.mubr.msk.bf16.mxu1 (!%p358_p9), %vm1824_vm0, %v1823_v18  ;;  %p1444_p13 = scmp.lt.s32.totalorder (!%p358_p9), %s1443_s9, 1  ;;  %s364_s13 = sand.u32 (!%p358_p9), 1, %s1795_s21  }
  0x23   : > { %s1442_s14 = sshll.u32 (!%p358_p9), %s364_s13, 6  ;;  %s1828_s12 = smov (!%p358_p9), 80  }
  0x24   : > { %s1973_s18 = scalar_lea.vmem (!%p358_p9), [#allocation2], %s1442_s14  ;;  %s1830_s14 = smov (!%p358_p9), 96  }
  0x25   : > { %v479_v23 = vld [vmem:[%s1973_s18 + $0x8] sm:$0xff] (!%p358_p9)  ;;  %v478_v24 = vld [vmem:[%s1973_s18] sm:$0xff] (!%p358_p9)  ;;  %v481_v28 = vld [vmem:[%s1973_s18 + $0x18] sm:$0xff] (!%p358_p9)  ;;  %s1839_s7 = smov (!%p358_p9), 49   ;;  %p1000_p0 = scmp.eq.s32.totalorder (!%p358_p9), %s1803_s23, 0 }
  0x26   : > { %v480_v30 = vld [vmem:[%s1973_s18 + $0x10] sm:$0xff] (!%p358_p9)  ;;  %v483_v59 = vld [vmem:[%s1973_s18 + $0x28] sm:$0xff] (!%p358_p9)  ;;  %v482_v60 = vld [vmem:[%s1973_s18 + $0x20] sm:$0xff] (!%p358_p9)  ;;  %p1001_p1 = scmp.eq.s32.totalorder (!%p358_p9), %s1803_s23, 1  ;;  %p462_p2 = scmp.lt.s32.totalorder (!%p358_p9), %s1803_s23, 1 }
  0x27   : > { %s2429_s24 = smov (!%p428_p10, %s1807_s24), 1  ;;  %s2431_s9 = smov (!%p426_p11, %s1443_s9), 0 }
  0x28   : > { %s1498_s20 = sshll.u32 %s2429_s24, 6  ;;  %s2433_s11 = smov (!%p1961_p12, %s440_s11), 1 }
  0x29   : > { %s459_s8 = scalar_lea.vmem %s2399_s3, %s1498_s20  ;;  %s2435_s9 = smov (!%p1444_p13, %s2431_s9), 1 }
  0x2a   : > { %v472_v9 = vld [vmem:[%s459_s8 + $0x10] sm:$0xff]  ;;  %v470_v10 = vld [vmem:[%s459_s8] sm:$0xff]  ;;  %v471_v11 = vld [vmem:[%s459_s8 + $0x8] sm:$0xff]  ;;  %s2437_s11 = smov (!%p1961_p12, %s2433_s11), 1  ;;  %s1450_s15 = sshll.u32 %s2429_s24, 4 }
  0x2b   : > { %543 = vperm.xlu0 %1703, %v472_v9   ;;  %535 = vperm.xlu1 %1701, %v470_v10   ;;  %v473_v13 = vld [vmem:[%s459_s8 + $0x18] sm:$0xff]  ;;  %v475_v14 = vld [vmem:[%s459_s8 + $0x28] sm:$0xff]  ;;  %v474_v15 = vld [vmem:[%s459_s8 + $0x20] sm:$0xff]  ;;  %s1449_s16 = sshll.u32 %s2435_s9, 3  ;;  %s1455_s17 = sshll.u32 %s2437_s11, 3 }
  0x2c   : > { %v476_v16 = vld [vmem:[%s459_s8 + $0x30] sm:$0xff]  ;;  %v477_v17 = vld [vmem:[%s459_s8 + $0x38] sm:$0xff]  ;;  %s434_s21 = sadd.s32 %s1450_s15, %s1449_s16  ;;  %s449_s19 = sadd.s32 %s1455_s17, %s1450_s15 }
  0x2d   : > { %s1451_s20 = sshll.u32 %s434_s21, 3  ;;  %s1457_s30 = sshll.u32 %s449_s19, 3 }
  0x2e   : > { %s1982_s9 = scalar_lea.vmem %s2397_s1, %s1451_s20  ;;  %s1988_s13 = scalar_lea.vmem %s2398_s2, %s1457_s30 }
  0x2f   : > { %1704 = vset.pattern.permute.xlu0 %v1822_v12  ;;  %539 = vperm.xlu1 %1701, %v471_v11   ;;  %v611_v36 = vld [vmem:[%s1982_s9 + $0x8] sm:$0xff]  ;;  %v610_v40 = vld [vmem:[%s1982_s9] sm:$0xff]  ;;  %v612_v53 = vld [vmem:[%s1982_s9 + $0x10] sm:$0xff]  ;;  %s1825_s8 = smov 16   ;;  %s1827_s11 = smov 48  }
  0x30   : > { %488 = vperm.xlu0 %1704, %v470_v10   ;;  %v671_v41 = vld [vmem:[%s1988_s13 + $0x8] sm:$0xff]  ;;  %v670_v45 = vld [vmem:[%s1988_s13] sm:$0xff]  ;;  %v672_v54 = vld [vmem:[%s1988_s13 + $0x10] sm:$0xff]  ;;  %s1831_s15 = smov 64   ;;  %s1832_s16 = smov 112  }
  0x31   : > { %v613_v57 = vld [vmem:[%s1982_s9 + $0x18] sm:$0xff]  ;;  %s1833_s17 = smov 15   ;;  %s2404_s21 = smov 127  }
  0x32   : > { %v673_v62 = vld [vmem:[%s1988_s13 + $0x18] sm:$0xff]  ;;  %s1836_s19 = smov 113   ;;  %s1837_s20 = smov 33  }
  0x33   : > { %1702 = vset.pattern.permute.xlu1 %v1822_v12  ;;  %s1838_s30 = smov 65   ;;  %s2439_s23 = smov (!%p462_p2, %s1803_s23), 1 }
  0x34   : > { %493 = vperm.xlu0 %1704, %v471_v11   ;;  %503 = vperm.xlu1 %1702, %v473_v13  }
  0x38   : > { %498 = vperm.xlu0 %1704, %v472_v9   ;;  %1705 = vset.pattern.permute.xlu1 %v1821_v8 }
  0x39   : > { %547 = vperm.xlu1 %1705, %v473_v13  }
  0x3c   : > { %513 = vperm.xlu0 %1704, %v475_v14  }
  0x3d   : > { %1706 = vset.pattern.permute.xlu1 %v1822_v12 }
  0x3e   : > { %508 = vperm.xlu1 %1706, %v474_v15  }
  0x40   : > { %518 = vperm.xlu0 %1704, %v476_v16  }
  0x42   : > { %1707 = vset.pattern.permute.xlu1 %v1821_v8 }
  0x43   : > { %551 = vperm.xlu1 %1707, %v474_v15  }
  0x44   : > { %1709 = vset.pattern.permute.xlu0 %v1821_v8 }
  0x45   : > { %559 = vperm.xlu0 %1709, %v476_v16   ;;  %v615_v16 = vld [vmem:[%s1982_s9 + $0x28] sm:$0xff] }
  0x47   : > { %555 = vperm.xlu1 %1707, %v475_v14  }
  0x49   : > { %1711 = vset.pattern.permute.xlu0 %v1822_v12 }
  0x4b   : > { %1708 = vset.pattern.permute.xlu1 %v1822_v12 }
  0x4c   : > { %523 = vperm.xlu1 %1708, %v477_v17  }
  0x50   : > { %1710 = vset.pattern.permute.xlu1 %v1821_v8 }
  0x51   : > { %563 = vperm.xlu1 %1710, %v477_v17  }
  0xaa   : > { %v536_v19 = vpop.permute.xlu1 %535  ;;  %v1968_v20 = vpop.permute.xlu0 %543 }
  0xae   : > { %v540_v21 = vpop.permute.xlu1 %539 }
  0xaf   : > { %v489_v22 = vpop.permute.xlu0 %488 }
  0xb0   : > { %v526_v29 = vmul.f32 %v489_v22, %v478_v24  ;;  %v618_v47 = vmul.f32 %v610_v40, %v489_v22  ;;  %v678_v51 = vmul.f32 %v670_v45, %v489_v22 }
  0xb2   : > { %v566_v38 = vadd.f32 %v536_v19, %v526_v29  ;;  %v626_v55 = vadd.f32 %v618_v47, %v536_v19  ;;  %v686_v63 = vadd.f32 %v678_v51, %v536_v19  ;;  %v675_v19 = vld [vmem:[%s1988_s13 + $0x28] sm:$0xff] }
  0xb3   : > { %v494_v25 = vpop.permute.xlu0 %493  ;;  %v504_v26 = vpop.permute.xlu1 %503 }
  0xb4   : > { %v527_v27 = vmul.f32 %v494_v25, %v479_v23  ;;  %v529_v31 = vmul.f32 %v504_v26, %v481_v28  ;;  %v619_v43 = vmul.f32 %v611_v36, %v494_v25  ;;  %v679_v48 = vmul.f32 %v671_v41, %v494_v25  ;;  %v614_v23 = vld [vmem:[%s1982_s9 + $0x20] sm:$0xff]  ;;  %v677_v41 = vld [vmem:[%s1988_s13 + $0x38] sm:$0xff] }
  0xb5   : > { %v621_v3 = vmul.f32 %v613_v57, %v504_v26  ;;  %v681_v7 = vmul.f32 %v673_v62, %v504_v26  ;;  %v674_v25 = vld [vmem:[%s1988_s13 + $0x20] sm:$0xff]  ;;  %v484_v26 = vld [vmem:[%s1973_s18 + $0x30] sm:$0xff] }
  0xb6   : > { %v567_v33 = vadd.f32 %v540_v21, %v527_v27  ;;  %v627_v52 = vadd.f32 %v619_v43, %v540_v21  ;;  %v687_v56 = vadd.f32 %v679_v48, %v540_v21  ;;  %v616_v43 = vld [vmem:[%s1982_s9 + $0x30] sm:$0xff] }
  0xb7   : > { %v499_v32 = vpop.permute.xlu0 %498 }
  0xb8   : > { %v528_v34 = vmul.f32 %v499_v32, %v480_v30  ;;  %v548_v35 = vpop.permute.xlu1 %547  ;;  %v1993_v42 = vpack.c.bf16 %v567_v33, %v566_v38  ;;  %v2006_v0 = vpack.c.bf16 %v627_v52, %v626_v55  ;;  %v620_v1 = vmul.f32 %v612_v53, %v499_v32  ;;  %v676_v52 = vld [vmem:[%s1988_s13 + $0x30] sm:$0xff]  ;;  %s1829_s13 = smov 32  }
  0xb9   : > { %v569_v37 = vadd.f32 %v548_v35, %v529_v31  ;;  %v680_v2 = vmul.f32 %v672_v54, %v499_v32  ;;  %v2008_v6 = vpack.c.bf16 %v687_v56, %v686_v63  ;;  %v629_v9 = vadd.f32 %v621_v3, %v548_v35  ;;  %v485_v32 = vld [vmem:[%s1973_s18 + $0x38] sm:$0xff]  ;;  %s1834_s18 = smov 1  }
  0xba   : > { %v568_v39 = vadd.f32 %v1968_v20, %v528_v34  ;;  %v1462_v50 = vmul.bf16 3216621497, %v1993_v42  ;;  %v1466_v12 = vmul.bf16 3216621497, %v2006_v0  ;;  %v628_v13 = vadd.f32 %v620_v1, %v1968_v20 }
  0xbb   : > { %v514_v58 = vpop.permute.xlu0 %513  ;;  %v688_v14 = vadd.f32 %v680_v2, %v1968_v20  ;;  %v689_v15 = vadd.f32 %v681_v7, %v548_v35  ;;  %v1470_v22 = vmul.bf16 3216621497, %v2008_v6  ;;  %v617_v35 = vld [vmem:[%s1982_s9 + $0x38] sm:$0xff]  ;;  %s1826_s9 = smov 17  }
  0xbc   : > { %v1995_v44 = vpack.c.bf16 %v569_v37, %v568_v39  ;;  %v531_v4 = vmul.f32 %v514_v58, %v483_v59  ;;  %v623_v24 = vmul.f32 %v615_v16, %v514_v58  ;;  %v2022_v20 = vpack.c.bf16 %v629_v9, %v628_v13 }
  0xbd   : > { %v509_v46 = vpop.permute.xlu1 %508  ;;  %v2024_v30 = vpack.c.bf16 %v689_v15, %v688_v14  ;;  %v683_v31 = vmul.f32 %v675_v19, %v514_v58 }
  0xbe   : > { %v1463_v49 = vmul.bf16 3216621497, %v1995_v44  ;;  %v530_v5 = vmul.f32 %v509_v46, %v482_v60  ;;  %v622_v33 = vmul.f32 %v614_v23, %v509_v46  ;;  %v682_v37 = vmul.f32 %v674_v25, %v509_v46 }
  0xbf   : > { %v519_v17 = vpop.permute.xlu0 %518  ;;  %v1471_v51 = vmul.bf16 3216621497, %v2024_v30 }
  0xc0   : > { %1717 = vpow.bf16 %v1463_v49  ;;  %v532_v38 = vmul.f32 %v519_v17, %v484_v26  ;;  %v624_v59 = vmul.f32 %v616_v43, %v519_v17  ;;  %v684_v63 = vmul.f32 %v676_v52, %v519_v17 }
  0xc1   : > { %1719 = vpow.bf16 %v1462_v50  ;;  %v1467_v50 = vmul.bf16 3216621497, %v2022_v20 }
  0xc2   : > { %v552_v61 = vpop.permute.xlu1 %551  ;;  %1721 = vpow.bf16 %v1466_v12 }
  0xc3   : > { %v570_v10 = vadd.f32 %v552_v61, %v530_v5  ;;  %v630_v45 = vadd.f32 %v622_v33, %v552_v61  ;;  %v690_v53 = vadd.f32 %v682_v37, %v552_v61 }
  0xc4   : > { %v560_v39 = vpop.permute.xlu0 %559 }
  0xc5   : > { %v572_v56 = vadd.f32 %v560_v39, %v532_v38  ;;  %v632_v3 = vadd.f32 %v624_v59, %v560_v39  ;;  %v692_v61 = vadd.f32 %v684_v63, %v560_v39 }
  0xc6   : > { %v556_v8 = vpop.permute.xlu1 %555 }
  0xc7   : > { %v571_v11 = vadd.f32 %v556_v8, %v531_v4  ;;  %v631_v34 = vadd.f32 %v623_v24, %v556_v8  ;;  %v691_v40 = vadd.f32 %v683_v31, %v556_v8 }
  0xc9   : > { %v2015_v21 = vpack.c.bf16 %v571_v11, %v570_v10  ;;  %v2033_v57 = vpack.c.bf16 %v631_v34, %v630_v45  ;;  %v2035_v60 = vpack.c.bf16 %v691_v40, %v690_v53 }
  0xcb   : > { %v1464_v27 = vmul.bf16 3216621497, %v2015_v21  ;;  %v524_v28 = vpop.permute.xlu1 %523  ;;  %v1718_v29 = vpop.eup %1717  ;;  %v1468_v4 = vmul.bf16 3216621497, %v2033_v57  ;;  %v1472_v7 = vmul.bf16 3216621497, %v2035_v60 }
  0xcc   : > { %v1720_v36 = vpop.eup %1719  ;;  %v533_v47 = vmul.f32 %v524_v28, %v485_v32  ;;  %v595_v49 = vadd.bf16 1065369472, %v1718_v29  ;;  %v625_v54 = vmul.f32 %v617_v35, %v524_v28  ;;  %v685_v46 = vmul.f32 %v677_v41, %v524_v28 }
  0xcd   : > { %1723 = vpow.bf16 %v1464_v27  ;;  %v594_v48 = vadd.bf16 1065369472, %v1720_v36  ;;  %v1722_v9 = vpop.eup %1721 }
  0xce   : > { %1725 = vpow.bf16 %v1470_v22  ;;  %v654_v23 = vadd.bf16 1065369472, %v1722_v9 }
  0xcf   : > { %1727 = vrcp.bf16 %v594_v48 }
  0xd0   : > { %v564_v55 = vpop.permute.xlu1 %563  ;;  %1729 = vrcp.bf16 %v595_v49 }
  0xd1   : > { %v573_v58 = vadd.f32 %v564_v55, %v533_v47  ;;  %v633_v62 = vadd.f32 %v625_v54, %v564_v55  ;;  %v693_v2 = vadd.f32 %v685_v46, %v564_v55  ;;  %1731 = vpow.bf16 %v1467_v50  ;;  %v1712_v54 = vld [vmem:[%s2400_s4] sm:$0xff]   ;;  %v1713_v55 = vld [vmem:[%s2400_s4 + $0x10] sm:$0xff]  }
  0xd2   : > { %1733 = vpow.bf16 %v1471_v51 }
  0xd3   : > { %v2037_v1 = vpack.c.bf16 %v573_v58, %v572_v56  ;;  %v2042_v8 = vpack.c.bf16 %v633_v62, %v632_v3  ;;  %v2044_v10 = vpack.c.bf16 %v693_v2, %v692_v61 }
  0xd5   : > { %v1465_v5 = vmul.bf16 3216621497, %v2037_v1  ;;  %v1469_v14 = vmul.bf16 3216621497, %v2042_v8  ;;  %v1473_v15 = vmul.bf16 3216621497, %v2044_v10 }
  0xd7   : > { %1735 = vpow.bf16 %v1465_v5  ;;  %v1715_v5 = vld [vmem:[%s2400_s4 + $0x18] sm:$0xff]  }
  0xd8   : > { %v1724_v11 = vpop.eup %1723  ;;  %1737 = vpow.bf16 %v1468_v4  ;;  %v1714_v4 = vld [vmem:[%s2400_s4 + $0x8] sm:$0xff]  }
  0xd9   : > { %v1726_v12 = vpop.eup %1725  ;;  %v596_v13 = vadd.bf16 1065369472, %v1724_v11  ;;  %1739 = vpow.bf16 %v1472_v7 }
  0xda   : > { %v1728_v16 = vpop.eup %1727  ;;  %v714_v26 = vadd.bf16 1065369472, %v1726_v12 }
  0xdb   : > { %1741 = vrcp.bf16 %v596_v13  ;;  %v1730_v17 = vpop.eup %1729  ;;  %v599_v19 = vmul.bf16 1065369472, %v1728_v16 }
  0xdc   : > { %1743 = vpow.bf16 %v1469_v14  ;;  %v601_v22 = vmul.bf16 1065369472, %v1730_v17  ;;  %v1732_v24 = vpop.eup %1731 }
  0xdd   : > { %1745 = vpow.bf16 %v1473_v15  ;;  %v606_v25 = vmul.bf16 %v599_v19, %v1993_v42  ;;  %v1734_v27 = vpop.eup %1733  ;;  %v655_v33 = vadd.bf16 1065369472, %v1732_v24 }
  0xde   : > { %v607_v29 = vmul.bf16 %v601_v22, %v1995_v44  ;;  %1747 = vrcp.bf16 %v654_v23  ;;  %v715_v35 = vadd.bf16 1065369472, %v1734_v27 }
  0xdf   : > { %1527 = vmatpush3.bf16.msra.mxu0 %v606_v25  ;;  %1614 = vmatpush3.bf16.msra.mxu1 %v606_v25  ;;  %1749 = vrcp.bf16 %v714_v26 }
  0xe0   : > { %1528 = vmatprep.subr.bf16.mxu0 %v1823_v18  ;;  %1611 = vmatprep.subr.bf16.mxu1 %v1823_v18 }
  0xe2   : > { %v1736_v28 = vpop.eup %1735 }
  0xe3   : > { %v597_v31 = vadd.bf16 1065369472, %v1736_v28  ;;  %v1738_v32 = vpop.eup %1737  ;;  %1529 = vmatpush3.bf16.msra.mxu0 %v607_v29  ;;  %1615 = vmatpush3.bf16.msra.mxu1 %v607_v29 }
  0xe4   : > { %v1740_v34 = vpop.eup %1739  ;;  %1530 = vmatprep.subr.bf16.mxu0 %v1823_v18  ;;  %1612 = vmatprep.subr.bf16.mxu1 %v1823_v18  ;;  %v656_v36 = vadd.bf16 1065369472, %v1738_v32 }
  0xe5   : > { %1751 = vrcp.bf16 %v597_v31  ;;  %v716_v38 = vadd.bf16 1065369472, %v1740_v34 }
  0xe6   : > { %v1742_v42 = vpop.eup %1741  ;;  %1753 = vrcp.bf16 %v655_v33 }
  0xe7   : > { %v603_v44 = vmul.bf16 1065369472, %v1742_v42  ;;  %v1744_v37 = vpop.eup %1743  ;;  %1755 = vrcp.bf16 %v715_v35 }
  0xe8   : > { %v1746_v40 = vpop.eup %1745  ;;  %1757 = vrcp.bf16 %v656_v36  ;;  %v657_v41 = vadd.bf16 1065369472, %v1744_v37 }
  0xe9   : > { %v608_v39 = vmul.bf16 %v603_v44, %v2015_v21  ;;  %1759 = vrcp.bf16 %v716_v38  ;;  %v717_v43 = vadd.bf16 1065369472, %v1746_v40  ;;  %v1748_v45 = vpop.eup %1747 }
  0xea   : > { %v1750_v47 = vpop.eup %1749  ;;  %1761 = vrcp.bf16 %v657_v41  ;;  %v659_v51 = vmul.bf16 1065369472, %v1748_v45 }
  0xeb   : > { %1531 = vmatpush3.bf16.msra.mxu0 %v608_v39  ;;  %1616 = vmatpush3.bf16.msra.mxu1 %v608_v39  ;;  %1763 = vrcp.bf16 %v717_v43  ;;  %v719_v52 = vmul.bf16 1065369472, %v1750_v47 }
  0xec   : > { %1532 = vmatprep.subr.bf16.mxu0 %v1823_v18  ;;  %1613 = vmatprep.subr.bf16.mxu1 %v1823_v18  ;;  %v666_v46 = vmul.bf16 %v659_v51, %v2006_v0 }
  0xed   : > { %v726_v58 = vmul.bf16 %v719_v52, %v2008_v6 }
  0xf0   : > { %v1752_v48 = vpop.eup %1751 }
  0xf1   : > { %v605_v49 = vmul.bf16 1065369472, %v1752_v48  ;;  %v1754_v50 = vpop.eup %1753 }
  0xf2   : > { %v1756_v53 = vpop.eup %1755  ;;  %v661_v59 = vmul.bf16 1065369472, %v1754_v50 }
  0xf3   : > { %v609_v21 = vmul.bf16 %v605_v49, %v2037_v1  ;;  %v1758_v56 = vpop.eup %1757  ;;  %v721_v62 = vmul.bf16 1065369472, %v1756_v53 }
  0xf4   : > { %v1760_v63 = vpop.eup %1759  ;;  %v667_v2 = vmul.bf16 %v661_v59, %v2022_v20  ;;  %v663_v6 = vmul.bf16 1065369472, %v1758_v56 }
  0xf5   : > { %1533 = vmatpush3.bf16.msra.mxu0 %v609_v21  ;;  %1617 = vmatpush3.bf16.msra.mxu1 %v609_v21  ;;  %v1762_v1 = vpop.eup %1761  ;;  %v727_v0 = vmul.bf16 %v721_v62, %v2024_v30  ;;  %v723_v3 = vmul.bf16 1065369472, %v1760_v63 }
  0xf6   : > { %1554 = vmatprep.subr.bf16.mxu1 %v1823_v18  ;;  %1582 = vmatprep.subr.bf16.mxu0 %v1823_v18  ;;  %v1764_v61 = vpop.eup %1763  ;;  %v668_v20 = vmul.bf16 %v663_v6, %v2033_v57  ;;  %v665_v7 = vmul.bf16 1065369472, %v1762_v1  ;;  %v1716_v57 = vld [vmem:[%s2400_s4 + $0x20] ss:$0 sps:$4 sm:$0xff]  }
  0xf7   : > { %v728_v30 = vmul.bf16 %v723_v3, %v2035_v60  ;;  %v725_v9 = vmul.bf16 1065369472, %v1764_v61 }
  0xf8   : > { %1535 = vmatmul.mubr.msk.bf16.vlgmr.msra.gmra.mrb[0].mxu0 %vm762_vm1, %v1712_v54  ;;  %1543 = vmatmul.mubr.msk.bf16.vlgmr.msra.gmra.mrb[0].mxu1 %vm762_vm1, %v1713_v55  ;;  %v669_v11 = vmul.bf16 %v665_v7, %v2042_v8 }
  0xf9   : > { %1555 = vmatpush3.bf16.msra.mxu1 %v666_v46  ;;  %1583 = vmatpush3.bf16.msra.mxu0 %v726_v58  ;;  %v729_v12 = vmul.bf16 %v725_v9, %v2044_v10 }
  0xfa   : > { %1556 = vmatprep.subr.bf16.mxu1 %v1823_v18  ;;  %1584 = vmatprep.subr.bf16.mxu0 %v1823_v18 }
  0xfb   : > { %1538 = vmatprep.mubr.msk.bf16.mxu0 %vm1824_vm0, %v1823_v18  ;;  %1546 = vmatprep.mubr.msk.bf16.mxu1 %vm1824_vm0, %v1823_v18 }
  0xfd   : > { %1557 = vmatpush3.bf16.msra.mxu1 %v667_v2  ;;  %1585 = vmatpush3.bf16.msra.mxu0 %v727_v0 }
  0xfe   : > { %1558 = vmatprep.subr.bf16.mxu1 %v1823_v18  ;;  %1586 = vmatprep.subr.bf16.mxu0 %v1823_v18 }
 0x100   : > { %1539 = vmatmul.mubr.msk.bf16.gmra.mrb[4].mxu0 %vm762_vm1, %v1714_v4  ;;  %1547 = vmatmul.mubr.msk.bf16.gmra.mrb[4].mxu1 %vm762_vm1, %v1715_v5 }
 0x101   : > { %1559 = vmatpush3.bf16.msra.mxu1 %v668_v20  ;;  %1587 = vmatpush3.bf16.msra.mxu0 %v728_v30 }
 0x102   : > { %1560 = vmatprep.subr.bf16.mxu1 %v1823_v18  ;;  %1588 = vmatprep.subr.bf16.mxu0 %v1823_v18 }
 0x103   : > { %1550 = vmatprep.mubr.msk.bf16.mxu1 %vm1824_vm0, %v1823_v18  ;;  %1590 = vmatprep.mubr.msk.bf16.mxu0 %vm1824_vm0, %v1823_v18 }
 0x105   : > { %1561 = vmatpush3.bf16.msra.mxu1 %v669_v11  ;;  %1589 = vmatpush3.bf16.msra.mxu0 %v729_v12 }
 0x108   : > { %1551 = vmatmul.mubr.msk.bf16.gmra.mrb[8].mxu1 %vm762_vm1, %v1716_v57  ;;  %1591 = vmatmul.mubr.msk.bf16.vlgmr.msra.gmra.mrb[8].mxu0 %vm762_vm1, %v1712_v54 }
 0x109   : > { %1562 = vmatprep.mubr.msk.bf16.mxu1 %vm1824_vm0, %v1823_v18  ;;  %1594 = vmatprep.mubr.msk.bf16.mxu0 %vm1824_vm0, %v1823_v18 }
 0x110   : > { %1563 = vmatmul.mubr.msk.bf16.vlgmr.msra.gmra.mrb[12].mxu1 %vm762_vm1, %v1712_v54  ;;  %1595 = vmatmul.mubr.msk.bf16.gmra.mrb[12].mxu0 %vm762_vm1, %v1714_v4 }
 0x111   : > { %1566 = vmatprep.mubr.msk.bf16.mxu1 %vm1824_vm0, %v1823_v18  ;;  %1598 = vmatprep.mubr.msk.bf16.mxu0 %vm1824_vm0, %v1823_v18 }
 0x118   : > { %1567 = vmatmul.mubr.msk.bf16.gmra.mrb[16].mxu1 %vm762_vm1, %v1714_v4  ;;  %1599 = vmatmul.mubr.msk.bf16.gmra.mrb[16].mxu0 %vm762_vm1, %v1713_v55 }
 0x119   : > { %1602 = vmatprep.mubr.msk.bf16.mxu0 %vm1824_vm0, %v1823_v18  ;;  %1570 = vmatprep.mubr.msk.bf16.mxu1 %vm1824_vm0, %v1823_v18 }
 0x120   : > { %1603 = vmatmul.mubr.msk.bf16.gmra.mrb[20].mxu0 %vm762_vm1, %v1715_v5  ;;  %1571 = vmatmul.mubr.msk.bf16.gmra.mrb[20].mxu1 %vm762_vm1, %v1713_v55 }
 0x121   : > { %1606 = vmatprep.mubr.msk.bf16.mxu0 %vm1824_vm0, %v1823_v18  ;;  %1574 = vmatprep.mubr.msk.bf16.mxu1 %vm1824_vm0, %v1823_v18 }
 0x128   : > { %1607 = vmatmul.mubr.msk.bf16.gmra.mrb[24].mxu0 %vm762_vm1, %v1716_v57  ;;  %1575 = vmatmul.mubr.msk.bf16.gmra.mrb[24].mxu1 %vm762_vm1, %v1715_v5 }
 0x129   : > { %1578 = vmatprep.mubr.msk.bf16.mxu1 %vm1824_vm0, %v1823_v18 }
 0x130   : > { %1579 = vmatmul.mubr.msk.bf16.gmra.mrb[28].mxu1 %vm762_vm1, %v1716_v57 }
 0x1cb   : > { %v2130_v60 = vpop.f32.mrb[0].mxu1  ;;  %v812_v8 = vpop.f32.mrb[0].mxu0 }
 0x1cc   : > { %v1544_v10 = vpop.f32.mrb[1].mxu1  ;;  %v1536_v13 = vpop.f32.mrb[1].mxu0 }
 0x1cd   : > { %v2132_v14 = vpop.f32.mrb[2].mxu1  ;;  %v815_v15 = vpop.f32.mrb[2].mxu0 }
 0x1ce   : > { %v1545_v16 = vpop.f32.mrb[3].mxu1  ;;  %v1537_v17 = vpop.f32.mrb[3].mxu0 }
 0x1d3   : > { %v2134_v19 = vpop.f32.mrb[4].mxu1  ;;  %v2136_v22 = vpop.f32.mrb[4].mxu0 }
 0x1d4   : > { %v1548_v23 = vpop.f32.mrb[5].mxu1  ;;  %v1540_v24 = vpop.f32.mrb[5].mxu0 }
 0x1d5   : > { %v2138_v25 = vpop.f32.mrb[6].mxu1  ;;  %v2140_v18 = vpop.f32.mrb[6].mxu0  ;;  %v982_v24 = vlaneseq }
 0x1d6   : > { %v1549_v26 = vpop.f32.mrb[7].mxu1  ;;  %v1541_v27 = vpop.f32.mrb[7].mxu0 }
 0x1db   : > { %v2142_v28 = vpop.f32.mrb[8].mxu1  ;;  %v950_v29 = vpop.f32.mrb[8].mxu0 }
 0x1dc   : > { %v1552_v31 = vpop.f32.mrb[9].mxu1  ;;  %v1592_v32 = vpop.f32.mrb[9].mxu0  ;;  %v2214_v29 = vand.u32 127, %v982_v24 }
 0x1dd   : > { %v847_v33 = vpop.f32.mrb[10].mxu1  ;;  %v952_v34 = vpop.f32.mrb[10].mxu0 }
 0x1de   : > { %v1553_v35 = vpop.f32.mrb[11].mxu1  ;;  %v1593_v42 = vpop.f32.mrb[11].mxu0  ;;  %vm996_vm9 = vcmp.lt.s32.totalorder %v2214_v29, 16  ;;  %vm997_vm14 = vcmp.ge.s32.totalorder %v2214_v29, 112 }
 0x1e3   : > { %v2144_v44 = vpop.f32.mrb[12].mxu1  ;;  %v956_v36 = vpop.f32.mrb[12].mxu0 }
 0x1e4   : > { %1005 = vrot.lane.b32.xlu1 %v2144_v44, %s1825_s8  ;;  %v1564_v37 = vpop.f32.mrb[13].mxu1  ;;  %v1596_v38 = vpop.f32.mrb[13].mxu0 }
 0x1e5   : > { %v2148_v39 = vpop.f32.mrb[14].mxu1  ;;  %v958_v40 = vpop.f32.mrb[14].mxu0 }
 0x1e6   : > { %v1565_v41 = vpop.f32.mrb[15].mxu1  ;;  %v1597_v43 = vpop.f32.mrb[15].mxu0 }
 0x1eb   : > { %v2150_v45 = vpop.f32.mrb[16].mxu1  ;;  %v962_v47 = vpop.f32.mrb[16].mxu0 }
 0x1ec   : > { %1099 = vrot.lane.b32.xlu0 %v2150_v45, %s1825_s8  ;;  %v1600_v48 = vpop.f32.mrb[17].mxu0  ;;  %v1568_v49 = vpop.f32.mrb[17].mxu1 }
 0x1ed   : > { %v964_v50 = vpop.f32.mrb[18].mxu0  ;;  %v895_v21 = vpop.f32.mrb[18].mxu1 }
 0x1ee   : > { %v1601_v51 = vpop.f32.mrb[19].mxu0  ;;  %v1569_v52 = vpop.f32.mrb[19].mxu1 }
 0x1f3   : > { %v2154_v53 = vpop.f32.mrb[20].mxu0  ;;  %v899_v54 = vpop.f32.mrb[20].mxu1 }
 0x1f4   : > { %1154 = vrot.lane.b32.xlu1 %v2154_v53, %s1825_s8  ;;  %v1604_v55 = vpop.f32.mrb[21].mxu0  ;;  %v1572_v56 = vpop.f32.mrb[21].mxu1 }
 0x1f5   : > { %v2158_v46 = vpop.f32.mrb[22].mxu0  ;;  %v901_v58 = vpop.f32.mrb[22].mxu1 }
 0x1f6   : > { %v1605_v59 = vpop.f32.mrb[23].mxu0  ;;  %v1573_v62 = vpop.f32.mrb[23].mxu1 }
 0x1f8   : > { %1002 = vrot.lane.b32.xlu1 %v812_v8, %s1826_s9 }
 0x1fb   : > { %v2161_v63 = vpop.f32.mrb[24].mxu0  ;;  %v905_v1 = vpop.f32.mrb[24].mxu1 }
 0x1fc   : > { %1066 = vrot.lane.b32.xlu1 %v2148_v39, %s1825_s8  ;;  %1240 = vrot.lane.b32.xlu0 %v2161_v63, %s1825_s8  ;;  %v1608_v2 = vpop.f32.mrb[25].mxu0  ;;  %v1576_v0 = vpop.f32.mrb[25].mxu1 }
 0x1fd   : > { %v979_v6 = vpop.f32.mrb[26].mxu0  ;;  %v907_v3 = vpop.f32.mrb[26].mxu1 }
 0x1fe   : > { %v1609_v61 = vpop.f32.mrb[27].mxu0  ;;  %v1577_v4 = vpop.f32.mrb[27].mxu1 }
 0x200   : > { %1072 = vrot.lane.b32.xlu1 %v2148_v39, %s1827_s11  ;;  %1063 = vrot.lane.b32.xlu0 %v815_v15, %s1825_s8 }
 0x203   : > { %v911_v5 = vpop.f32.mrb[28].mxu1 }
 0x204   : > { %1078 = vrot.lane.b32.xlu1 %v2148_v39, %s1828_s12  ;;  %1069 = vrot.lane.b32.xlu0 %v2148_v39, %s1829_s13  ;;  %v1580_v20 = vpop.f32.mrb[29].mxu1 }
 0x205   : > { %v913_v30 = vpop.f32.mrb[30].mxu1 }
 0x206   : > { %v1581_v7 = vpop.f32.mrb[31].mxu1 }
 0x208   : > { %1081 = vrot.lane.b32.xlu1 %v2148_v39, %s1830_s14  ;;  %1075 = vrot.lane.b32.xlu0 %v2148_v39, %s1831_s15 }
 0x20c   : > { %1084 = vrot.lane.b32.xlu1 %v2148_v39, %s1832_s16  ;;  %1097 = vrot.lane.b32.xlu0 %v2136_v22, %s1833_s17 }
 0x210   : > { %1143 = vrot.lane.b32.xlu1 %v2140_v18, %s1834_s18  ;;  %1216 = vrot.lane.b32.xlu0 %v2158_v46, %s1831_s15  ;;  %s1845_s15 = smov 111  }
 0x214   : > { %1207 = vrot.lane.b32.xlu1 %v2158_v46, %s1825_s8  ;;  %1148 = vrot.lane.b32.xlu0 %v2132_v14, %s2404_s21 }
 0x218   : > { %1210 = vrot.lane.b32.xlu1 %v2158_v46, %s1829_s13  ;;  %s1843_s13 = smov 31  }
 0x256   : > { %v1006_v9 = vpop.permute.xlu1 %1005 }
 0x257   : > { %v1007_v11 = vsel %vm1004_vm2, %v1006_v9, %v2144_v44 }
 0x258   : > { %1008 = vrot.lane.b32.xlu1 %v1007_v11, %s1825_s8 }
 0x25c   : > { %1213 = vrot.lane.b32.xlu1 %v2158_v46, %s1827_s11  ;;  %s2403_s11 = smov 81  }
 0x25e   : > { %v1100_v12 = vpop.permute.xlu0 %1099 }
 0x25f   : > { %v1101_v57 = vsel %vm1004_vm2, %v1100_v12, %v2150_v45 }
 0x260   : > { %1102 = vrot.lane.b32.xlu0 %v1101_v57, %s1825_s8 }
 0x264   : > { %1219 = vrot.lane.b32.xlu0 %v2158_v46, %s1828_s12  ;;  %s1842_s12 = smov 47  }
 0x266   : > { %v1155_v8 = vpop.permute.xlu1 %1154 }
 0x267   : > { %v1156_v10 = vsel %vm1004_vm2, %v1155_v8, %v2154_v53 }
 0x268   : > { %1157 = vrot.lane.b32.xlu1 %v1156_v10, %s1825_s8  ;;  %1222 = vrot.lane.b32.xlu0 %v2158_v46, %s1830_s14  ;;  %s1844_s14 = smov 63  }
 0x26a   : > { %v2201_v13 = vpop.permute.xlu1 %1002 }
 0x26c   : > { %1152 = vrot.lane.b32.xlu1 %v2134_v19, %s1836_s19  ;;  %1225 = vrot.lane.b32.xlu0 %v2158_v46, %s1832_s16 }
 0x26e   : > { %v1067_v14 = vpop.permute.xlu1 %1066  ;;  %v1241_v15 = vpop.permute.xlu0 %1240 }
 0x26f   : > { %v1087_v16 = vsel %vm1036_vm3, %v2148_v39, %v1067_v14  ;;  %v1242_v17 = vsel %vm1004_vm2, %v1241_v15, %v2161_v63 }
 0x270   : > { %1243 = vrot.lane.b32.xlu0 %v1242_v17, %s1825_s8  ;;  %s1840_s8 = smov 97  }
 0x272   : > { %v1073_v22 = vpop.permute.xlu1 %1072  ;;  %v1064_v23 = vpop.permute.xlu0 %1063 }
 0x276   : > { %v1079_v19 = vpop.permute.xlu1 %1078  ;;  %v1070_v18 = vpop.permute.xlu0 %1069 }
 0x277   : > { %v1088_v26 = vsel %vm1038_vm4, %v1087_v16, %v1070_v18 }
 0x278   : > { %v1089_v27 = vsel %vm1040_vm5, %v1088_v26, %v1073_v22 }
 0x27a   : > { %v1082_v31 = vpop.permute.xlu1 %1081  ;;  %v1076_v32 = vpop.permute.xlu0 %1075 }
 0x27b   : > { %v1090_v33 = vsel %vm762_vm1, %v1089_v27, %v1076_v32  ;;  %v988_v27 = vand.u32 15, %v2214_v29 }
 0x27c   : > { %v1091_v34 = vsel %vm1043_vm6, %v1090_v33, %v1079_v19 }
 0x27d   : > { %v1092_v35 = vsel %vm1045_vm7, %v1091_v34, %v1082_v31  ;;  %vm2299_vm12 = vcmp.ge.s32.totalorder %v988_v27, 1  ;;  %vm2314_vm13 = vcmp.le.s32.totalorder %v988_v27, 14 }
 0x27e   : > { %v1085_v42 = vpop.permute.xlu1 %1084  ;;  %v2230_v47 = vpop.permute.xlu0 %1097 }
 0x27f   : > { %v1093_v36 = vsel %vm1047_vm8, %v1092_v35, %v1085_v42 }
 0x280   : > { %v2223_v37 = vsel %vm996_vm9, %v1093_v36, %v1064_v23 }
 0x282   : > { %v2225_v38 = vpop.permute.xlu1 %1143  ;;  %v1217_v48 = vpop.permute.xlu0 %1216 }
 0x286   : > { %v1208_v39 = vpop.permute.xlu1 %1207  ;;  %v2236_v21 = vpop.permute.xlu0 %1148 }
 0x287   : > { %v1228_v40 = vsel %vm1036_vm3, %v2158_v46, %v1208_v39 }
 0x28a   : > { %v1211_v41 = vpop.permute.xlu1 %1210 }
 0x28b   : > { %v1229_v43 = vsel %vm1038_vm4, %v1228_v40, %v1211_v41 }
 0x2ca   : > { %v1009_v49 = vpop.permute.xlu1 %1008 }
 0x2cb   : > { %v1010_v50 = vsel %vm1004_vm2, %v1009_v49, %v2144_v44 }
 0x2cc   : > { %1015 = vrot.lane.b32.xlu1 %v1010_v50, %s1834_s18  ;;  %1012 = vrot.lane.b32.xlu0 %v1010_v50, %s1836_s19 }
 0x2ce   : > { %v1214_v51 = vpop.permute.xlu1 %1213 }
 0x2cf   : > { %v1230_v52 = vsel %vm1040_vm5, %v1229_v43, %v1214_v51 }
 0x2d0   : > { %1021 = vrot.lane.b32.xlu1 %v1010_v50, %s1837_s20  ;;  %1018 = vrot.lane.b32.xlu0 %v1010_v50, %s1826_s9  ;;  %v1231_v44 = vsel %vm762_vm1, %v1230_v52, %v1217_v48 }
 0x2d2   : > { %v1103_v54 = vpop.permute.xlu0 %1102 }
 0x2d3   : > { %v1104_v58 = vsel %vm1004_vm2, %v1103_v54, %v2150_v45 }
 0x2d4   : > { %1027 = vrot.lane.b32.xlu1 %v1010_v50, %s1838_s30  ;;  %1024 = vrot.lane.b32.xlu0 %v1010_v50, %s1839_s7 }
 0x2d6   : > { %v1220_v55 = vpop.permute.xlu0 %1219 }
 0x2d7   : > { %v1232_v56 = vsel %vm1043_vm6, %v1231_v44, %v1220_v55 }
 0x2d8   : > { %1033 = vrot.lane.b32.xlu1 %v1010_v50, %s1840_s8  ;;  %1030 = vrot.lane.b32.xlu0 %v1010_v50, %s2403_s11  ;;  %s1846_s11 = smov 79  }
 0x2da   : > { %v1223_v46 = vpop.permute.xlu0 %1222  ;;  %v1158_v2 = vpop.permute.xlu1 %1157 }
 0x2db   : > { %v1233_v59 = vsel %vm1045_vm7, %v1232_v56, %v1223_v46  ;;  %v1159_v45 = vsel %vm1004_vm2, %v1158_v2, %v2154_v53  ;;  %v1282_v53 = vld [vmem:[%s2401_s5] sm:$0xff] }
 0x2dc   : > { %1109 = vrot.lane.b32.xlu0 %v1104_v58, %s1833_s17  ;;  %1106 = vrot.lane.b32.xlu1 %v1104_v58, %s2404_s21  ;;  %s1847_s21 = smov 95  }
 0x2de   : > { %v1226_v62 = vpop.permute.xlu0 %1225 }
 0x2df   : > { %v2252_v1 = vsel %vm1047_vm8, %v1233_v59, %v1226_v62 }
 0x2e0   : > { %1115 = vrot.lane.b32.xlu0 %v1104_v58, %s1842_s12  ;;  %1112 = vrot.lane.b32.xlu1 %v1104_v58, %s1843_s13 }
 0x2e2   : > { %v1244_v0 = vpop.permute.xlu0 %1243 }
 0x2e3   : > { %v1245_v6 = vsel %vm1004_vm2, %v1244_v0, %v2161_v63 }
 0x2e4   : > { %1118 = vrot.lane.b32.xlu0 %v1104_v58, %s1844_s14  ;;  %1127 = vrot.lane.b32.xlu1 %v1104_v58, %s1845_s15 }
 0x2e8   : > { %1121 = vrot.lane.b32.xlu0 %v1104_v58, %s1846_s11  ;;  %1161 = vrot.lane.b32.xlu1 %v1159_v45, %s1836_s19 }
 0x2ec   : > { %1124 = vrot.lane.b32.xlu0 %v1104_v58, %s1847_s21  ;;  %1167 = vrot.lane.b32.xlu1 %v1159_v45, %s1826_s9  ;;  %s2406_s9 = smov 81  }
 0x2f0   : > { %1164 = vrot.lane.b32.xlu0 %v1159_v45, %s1834_s18  ;;  %1182 = vrot.lane.b32.xlu1 %v1159_v45, %s1840_s8  ;;  %s2407_s18 = smov 127  }
 0x2f4   : > { %1170 = vrot.lane.b32.xlu0 %v1159_v45, %s1837_s20  ;;  %1250 = vrot.lane.b32.xlu1 %v1245_v6, %s1833_s17  ;;  %s1195_s17 = scalar_select %p1001_p1, 1, 0 }
 0x2f8   : > { %1173 = vrot.lane.b32.xlu0 %v1159_v45, %s1839_s7  ;;  %1204 = vrot.lane.b32.xlu1 %v2138_v25, %s1832_s16  ;;  %v2273_v25 = vpop.permute.xlu1 %1152  ;;  %s1052_s16 = scalar_select %p1000_p0, 1, 0 }
 0x2fa   : > { %v1053_v17 = vstv %s1052_s16 }
 0x2fb   : > { %vm1054_vm10 = vcmp.eq.s32.totalorder %v1053_v17, 1 }
 0x2fc   : > { %1176 = vrot.lane.b32.xlu0 %v1159_v45, %s1838_s30  ;;  %1256 = vrot.lane.b32.xlu1 %v1245_v6, %s1842_s12  ;;  %vm2291_vm11 = vmand %vm996_vm9, %vm1054_vm10 }
 0x2fd   : > { %v1095_v49 = vsel %vm2291_vm11, 0.0, %v2223_v37  ;;  %v1145_v37 = vsel %vm2299_vm12, %v2225_v38, 0.0 }
 0x300   : > { %1179 = vrot.lane.b32.xlu0 %v1159_v45, %s2406_s9  ;;  %1259 = vrot.lane.b32.xlu1 %v1245_v6, %s1844_s14 }
 0x304   : > { %1262 = vrot.lane.b32.xlu1 %v1245_v6, %s1846_s11  ;;  %1247 = vrot.lane.b32.xlu0 %v1245_v6, %s2407_s18 }
 0x308   : > { %1265 = vrot.lane.b32.xlu1 %v1245_v6, %s1847_s21  ;;  %1253 = vrot.lane.b32.xlu0 %v1245_v6, %s1843_s13  ;;  %s1460_s21 = sshll.u32 %s2429_s24, 1 }
 0x309   : > { %s465_s30 = sadd.s32 %s1460_s21, %s2439_s23 }
 0x30a   : > { %s1461_s7 = sshll.u32 %s465_s30, 2 }
 0x30b   : > { %s467_s11 = scalar_lea.vmem %s2402_s6, %s1461_s7 }
 0x30c   : > { %1268 = vrot.lane.b32.xlu1 %v1245_v6, %s1845_s15  ;;  %1285 = vperm.xlu0 %1711, %v1282_v53  }
 0x310   : > { %1238 = vrot.lane.b32.xlu0 %v2142_v28, %s1845_s15 }
 0x33e   : > { %v1016_v63 = vpop.permute.xlu1 %1015  ;;  %v1013_v3 = vpop.permute.xlu0 %1012 }
 0x33f   : > { %v1037_v30 = vsel %vm1036_vm3, %v1013_v3, %v1016_v63  ;;  %v1196_v63 = vstv %s1195_s17 }
 0x340   : > { %vm1197_vm15 = vcmp.eq.s32.totalorder %v1196_v63, 1 }
 0x341   : > { %vm2340_vm0 = vmand %vm997_vm14, %vm1197_vm15 }
 0x342   : > { %v1022_v61 = vpop.permute.xlu1 %1021  ;;  %v1019_v4 = vpop.permute.xlu0 %1018 }
 0x343   : > { %v1039_v11 = vsel %vm1038_vm4, %v1037_v30, %v1019_v4  ;;  %v1150_v30 = vsel %vm2314_vm13, %v2236_v21, 0.0 }
 0x344   : > { %v1041_v12 = vsel %vm1040_vm5, %v1039_v11, %v1022_v61 }
 0x346   : > { %v1028_v5 = vpop.permute.xlu1 %1027  ;;  %v1025_v20 = vpop.permute.xlu0 %1024 }
 0x347   : > { %v1042_v28 = vsel %vm762_vm1, %v1041_v12, %v1025_v20 }
 0x348   : > { %v1044_v10 = vsel %vm1043_vm6, %v1042_v28, %v1028_v5 }
 0x34a   : > { %v1034_v7 = vpop.permute.xlu1 %1033  ;;  %v1031_v9 = vpop.permute.xlu0 %1030 }
 0x34b   : > { %v1046_v16 = vsel %vm1045_vm7, %v1044_v10, %v1031_v9 }
 0x34c   : > { %v1048_v22 = vsel %vm1047_vm8, %v1046_v16, %v1034_v7 }
 0x34d   : > { %v1051_v18 = vsel %vm996_vm9, %v1048_v22, %v2201_v13 }
 0x34e   : > { %v1107_v57 = vpop.permute.xlu1 %1106  ;;  %v1110_v8 = vpop.permute.xlu0 %1109  ;;  %v1058_v34 = vsel %vm2291_vm11, 0.0, %v1051_v18 }
 0x34f   : > { %v1130_v19 = vsel %vm1036_vm3, %v1107_v57, %v1110_v8  ;;  %v1061_v41 = vsel %vm2299_vm12, %v1058_v34, 0.0 }
 0x350   : > { %v1096_v52 = vadd.f32 %v1095_v49, %v1061_v41 }
 0x352   : > { %v1113_v14 = vpop.permute.xlu1 %1112  ;;  %v1116_v15 = vpop.permute.xlu0 %1115 }
 0x353   : > { %v1131_v26 = vsel %vm1038_vm4, %v1130_v19, %v1113_v14 }
 0x354   : > { %v1132_v35 = vsel %vm1040_vm5, %v1131_v26, %v1116_v15 }
 0x356   : > { %v1128_v23 = vpop.permute.xlu1 %1127  ;;  %v1119_v24 = vpop.permute.xlu0 %1118 }
 0x357   : > { %v1133_v42 = vsel %vm762_vm1, %v1132_v35, %v1119_v24 }
 0x35a   : > { %v1162_v31 = vpop.permute.xlu1 %1161  ;;  %v1122_v32 = vpop.permute.xlu0 %1121 }
 0x35b   : > { %v1134_v36 = vsel %vm1043_vm6, %v1133_v42, %v1122_v32 }
 0x35e   : > { %v1168_v39 = vpop.permute.xlu1 %1167  ;;  %v1125_v40 = vpop.permute.xlu0 %1124 }
 0x35f   : > { %v1135_v43 = vsel %vm1045_vm7, %v1134_v36, %v1125_v40 }
 0x360   : > { %v1136_v48 = vsel %vm1047_vm8, %v1135_v43, %v1128_v23 }
 0x361   : > { %v1137_v50 = vsel %vm996_vm9, %v1136_v48, %v2230_v47 }
 0x362   : > { %v1138_v54 = vsel %vm2291_vm11, 0.0, %v1137_v50  ;;  %v1183_v44 = vpop.permute.xlu1 %1182  ;;  %v1165_v55 = vpop.permute.xlu0 %1164 }
 0x363   : > { %v1141_v56 = vsel %vm2314_vm13, %v1138_v54, 0.0  ;;  %v1185_v45 = vsel %vm1036_vm3, %v1162_v31, %v1165_v55 }
 0x364   : > { %v1142_v46 = vadd.f32 %v1141_v56, %v1096_v52  ;;  %v1186_v53 = vsel %vm1038_vm4, %v1185_v45, %v1168_v39 }
 0x366   : > { %v1146_v58 = vadd.f32 %v1145_v37, %v1142_v46  ;;  %v1171_v47 = vpop.permute.xlu0 %1170  ;;  %v1251_v59 = vpop.permute.xlu1 %1250 }
 0x367   : > { %v1187_v3 = vsel %vm1040_vm5, %v1186_v53, %v1171_v47 }
 0x368   : > { %v1147_v62 = vadd.f32 %v1146_v58, %v2130_v60 }
 0x36a   : > { %v1174_v2 = vpop.permute.xlu0 %1173  ;;  %v1205_v0 = vpop.permute.xlu1 %1204  ;;  %v1151_v57 = vadd.f32 %v1150_v30, %v1147_v62 }
 0x36b   : > { %v1188_v61 = vsel %vm762_vm1, %v1187_v3, %v1174_v2  ;;  %v1235_v11 = vsel %vm997_vm14, %v2252_v1, %v1205_v0 }
 0x36c   : > { %v1236_v10 = vsel %vm2340_vm0, 0.0, %v1235_v11 }
 0x36e   : > { %v1177_v6 = vpop.permute.xlu0 %1176  ;;  %v1257_v5 = vpop.permute.xlu1 %1256 }
 0x36f   : > { %v1189_v38 = vsel %vm1043_vm6, %v1188_v61, %v1177_v6 }
 0x372   : > { %v1180_v4 = vpop.permute.xlu0 %1179 }
 0x373   : > { %v1190_v60 = vsel %vm1045_vm7, %v1189_v38, %v1180_v4 }
 0x374   : > { %v1191_v20 = vsel %vm1047_vm8, %v1190_v60, %v1183_v44 }
 0x375   : > { %v1194_v9 = vsel %vm997_vm14, %v1191_v20, %v2273_v25  ;;  %v1260_v25 = vpop.permute.xlu1 %1259 }
 0x376   : > { %v1201_v12 = vsel %vm2340_vm0, 0.0, %v1194_v9  ;;  %v1248_v8 = vpop.permute.xlu0 %1247 }
 0x377   : > { %v1202_v21 = vsel %vm2299_vm12, %v1201_v12, 0.0  ;;  %v1271_v1 = vsel %vm1036_vm3, %v1248_v8, %v1251_v59 }
 0x378   : > { %v1203_v28 = vadd.f32 %v1202_v21, %v1151_v57 }
 0x379   : > { %v1263_v16 = vpop.permute.xlu1 %1262 }
 0x37a   : > { %v1237_v14 = vadd.f32 %v1236_v10, %v1203_v28  ;;  %v1254_v15 = vpop.permute.xlu0 %1253 }
 0x37b   : > { %v1272_v17 = vsel %vm1038_vm4, %v1271_v1, %v1254_v15 }
 0x37c   : > { %v1273_v22 = vsel %vm1040_vm5, %v1272_v17, %v1257_v5 }
 0x37d   : > { %v1266_v23 = vpop.permute.xlu1 %1265  ;;  %v1274_v24 = vsel %vm762_vm1, %v1273_v22, %v1260_v25 }
 0x37e   : > { %v1275_v19 = vsel %vm1043_vm6, %v1274_v24, %v1263_v16 }
 0x37f   : > { %v1276_v27 = vsel %vm1045_vm7, %v1275_v19, %v1266_v23 }
 0x381   : > { %v1269_v26 = vpop.permute.xlu1 %1268 }
 0x382   : > { %v1277_v31 = vsel %vm1047_vm8, %v1276_v27, %v1269_v26 }
 0x38b   : > { %v1286_v18 = vpop.permute.xlu0 %1285 }
 0x38f   : > { %v1239_v32 = vpop.permute.xlu0 %1238 }
 0x390   : > { %v1278_v33 = vsel %vm997_vm14, %v1277_v31, %v1239_v32 }
 0x391   : > { %v1279_v34 = vsel %vm2340_vm0, 0.0, %v1278_v33 }
 0x392   : > { %v1280_v35 = vsel %vm2314_vm13, %v1279_v34, 0.0 }
 0x393   : > { %v1281_v42 = vadd.f32 %v1280_v35, %v1237_v14 }
 0x395   : > { %v1288_v13 = vadd.f32 %v1286_v18, %v1281_v42 }
 0x397   : > { %1289 = vst [vmem:[%s467_s11] sm:$0xf] %v1288_v13 }
 0x398 PF: > { %s16_s27 = sadd.s32 1, %s1819_s27   ;;  %s2416_s21 = smov %s1799_s22 }
 0x399   : > { %p13_p3 = scmp.ge.s32.totalorder %s16_s27, 6   ;;  %s2417_s22 = smov %s1934_s10 }
 0x39a   : > { %s2418_s23 = smov %s1811_s25  ;;  %s2419_s24 = smov %s1815_s26 }
 0x39b   : > { %s2420_s25 = smov %s2423_s28  ;;  %s2421_s26 = smov %s2427_s29 }
 0x39c   :  { %15 = sbr.rel (!%p13_p3) target bundleno = 4 (0x4), region = 126 }

</bundles_post_ra>
